<compile_context>
chip_gen: v5e
topology: v5e:2x2
jax: 0.10.0
libtpu: 0.0.40
codegen_flags: <defaults>
</compile_context>

<pallas_src>
import functools

import jax
import jax.numpy as jnp
import numpy as np
from jax import lax
from jax.experimental import pallas as pl
from jax.experimental.pallas import tpu as pltpu


def _round_up(x, m):
    return (x + m - 1) // m * m


# ---------------------------------------------------------------------------
# Pallas kernel: grouped cross-correlation as one deep, lane-aligned matmul
# ---------------------------------------------------------------------------
def _xcorr_matmul_kernel(a_ref, xcol_ref, o_ref):
    """
    a_ref    : (KP, LP)  bf16  expanded filters for one batch item
                               (anchor k on sublanes, (c_in, tap) on lanes;
                                bias and out_scale already folded in)
    xcol_ref : (LP, PP)  bf16  im2col of the padded search image
                               ((c_in, tap) on sublanes, pixel on lanes)
    o_ref    : (KP, PP)  f32   response map (lane-dense, unmasked store)
    """
    o_ref[...] = jnp.dot(a_ref[...], xcol_ref[...],
                         preferred_element_type=jnp.float32)


# ---------------------------------------------------------------------------
# Forward wrapper (only cheap layout prep + the tiny template expansion in XLA)
# ---------------------------------------------------------------------------
def siamfc_head_rpn_forward(z, x, conv_w, conv_b, out_scale=0.001):
    """z: (zn, zc, zh, zw), x: (zn, zc, h, w), conv_w: (zc*K, zc) or None."""
    zn, zc, zh, zw = z.shape
    nx, c, h, w = x.shape
    assert nx == zn and c == zc, "standard SiamFC usage: nx == zn, c == zc"
    # TODO(synk): the nx != zn batch-folding branch of the PyTorch view chain is
    # not covered (standard SiamFC tracking always calls with nx == zn).

    if conv_w is None:                      # zc not in {64,128,320}: no expansion
        conv_w = jnp.eye(zc, dtype=jnp.float32)
        conv_b = jnp.zeros((zc,), dtype=jnp.float32)
    OC = conv_w.shape[0]
    K = OC // zc

    pad = zh // 2                           # F.conv2d(padding=zh//2): both dims
    Ho = h + 2 * pad - zh + 1
    Wo = w + 2 * pad - zw + 1
    Lz = zh * zw
    C = zc
    L = C * Lz                              # contraction depth (c_in, tap)
    P = Ho * Wo                             # output pixels

    KP = _round_up(max(K, 8), 8)            # sublane-dense output rows
    LP = _round_up(L, 128)                  # lane-aligned contraction dim
    PP = _round_up(P, 128)                  # lane-dense output columns

    f32 = jnp.float32

    # --- template expansion (1x1 conv) merged over (n, k): one tiny XLA einsum.
    #     Result laid out as filt[n, k, c_in*Lz + tap], matching xcol's rows.
    zflat = z.astype(f32).reshape(zn, C, Lz)
    g = jnp.einsum("oc,nct->not", conv_w.astype(f32), zflat,
                   precision=lax.Precision.HIGHEST)           # (zn, K*C, Lz)
    g = g + conv_b.astype(f32)[None, :, None]                  # bias per (k, c_in)
    filt = g.reshape(zn, K, C, Lz).reshape(zn, K, L)           # (zn, K, C*Lz)
    filt = filt * jnp.asarray(out_scale, f32)                  # fold out_scale
    filt = jnp.pad(filt, ((0, 0), (0, KP - K), (0, LP - L)))
    filt = filt.astype(jnp.bfloat16)

    # --- im2col of the zero-padded search image: rows (c_in, tap), cols pixel.
    x_pad = jnp.pad(x.astype(f32), ((0, 0), (0, 0), (pad, pad), (pad, pad)))
    patches = [x_pad[:, :, dy:dy + Ho, dx:dx + Wo]
               for dy in range(zh) for dx in range(zw)]        # tap = dy*zw + dx
    xcol = jnp.stack(patches, axis=2)                          # (zn, C, Lz, Ho, Wo)
    xcol = xcol.reshape(zn, L, P)
    xcol = jnp.pad(xcol, ((0, 0), (0, LP - L), (0, PP - P)))
    xcol = xcol.astype(jnp.bfloat16)

    out = pl.pallas_call(
        _xcorr_matmul_kernel,
        out_shape=jax.ShapeDtypeStruct((zn, KP, PP), jnp.float32),
        grid=(zn,),
        in_specs=[
            pl.BlockSpec((None, KP, LP), lambda n: (n, 0, 0)),
            pl.BlockSpec((None, LP, PP), lambda n: (n, 0, 0)),
        ],
        out_specs=pl.BlockSpec((None, KP, PP), lambda n: (n, 0, 0)),
        compiler_params=pltpu.CompilerParams(
            dimension_semantics=("parallel",)),
    )(filt, xcol)

    # drop the K / pixel padding (cheap XLA slice + free reshape)
    return out[:, :K, :P].reshape(zn, K, Ho, Wo)


def make_siamfc_head_rpn_params(key, out_scale=0.001):
    # Only cls_64 is instantiated for the demo; cls_128 / cls_256 are analogous.
    k1, k2 = jax.random.split(key)
    return {
        "out_scale": out_scale,
        "cls_64_w": 0.05 * jax.random.normal(k1, (64 * 3, 64), jnp.float32),
        "cls_64_b": 0.05 * jax.random.normal(k2, (64 * 3,), jnp.float32),
    }


def siamfc_head_rpn_apply(params, z, x):
    zc = z.shape[1]
    if zc == 64:
        w, b = params["cls_64_w"], params["cls_64_b"]
    elif zc == 128:
        w, b = params.get("cls_128_w"), params.get("cls_128_b")
    elif zc == 320:
        w, b = params.get("cls_256_w"), params.get("cls_256_b")
    else:
        w, b = None, None
    return siamfc_head_rpn_forward(z, x, w, b, params["out_scale"])


# ---------------------------------------------------------------------------
# Pure-JAX reference mirroring the PyTorch module (for correctness check)
# ---------------------------------------------------------------------------
def ref_forward(params, z, x):
    zn, zc, zh, zw = z.shape
    nx, c, h, w = x.shape
    if zc == 64:
        wmat, b = params["cls_64_w"], params["cls_64_b"]
        zconv = jnp.einsum("oc,nchw->nohw", wmat, z,
                           precision=lax.Precision.HIGHEST)
        zconv = zconv + b[None, :, None, None]
    else:
        zconv = z
    kernels = zconv.reshape(-1, zc, zh, zw)
    x2 = x.reshape(-1, zn * c, h, w)
    out = lax.conv_general_dilated(
        x2, kernels, window_strides=(1, 1),
        padding=[(zh // 2, zh // 2), (zh // 2, zh // 2)],
        dimension_numbers=("NCHW", "OIHW", "NCHW"),
        feature_group_count=zn,
        precision=lax.Precision.HIGHEST)
    out = out.reshape(nx, -1, out.shape[-2], out.shape[-1])
    return out * params["out_scale"]


if __name__ == "__main__":
    key = jax.random.PRNGKey(0)
    kz, kx, kp = jax.random.split(key, 3)

    ZN, ZC, ZH, ZW = 2, 64, 5, 5      # template (batch, channels fixed by module)
    H, W = 16, 16                     # search spatial

    z = jax.random.normal(kz, (ZN, ZC, ZH, ZW), jnp.float32)
    x = jax.random.normal(kx, (ZN, ZC, H, W), jnp.float32)
    params = make_siamfc_head_rpn_params(kp)

    fwd = jax.jit(functools.partial(siamfc_head_rpn_apply, params))
    out = jax.block_until_ready(fwd(z, x))

    ref = ref_forward(params, z, x)
    assert out.shape == (ZN, 3, H, W), out.shape
    # bf16 MXU operands with f32 accumulation vs f32-HIGHEST reference
    np.testing.assert_allclose(np.asarray(out), np.asarray(ref),
                               rtol=2e-2, atol=1e-3)

    print("KERNEL_OK")
</pallas_src>

<mosaic_0001>
module attributes {stable_mosaic.version = 11 : i64} {
  func.func @_xcorr_matmul_kernel(%arg0: i32, %arg1: memref<1x8x1664xbf16, #tpu.memory_space<vmem>>, %arg2: memref<1x1664x256xbf16, #tpu.memory_space<vmem>>, %arg3: memref<1x8x256xf32, #tpu.memory_space<vmem>>) attributes {dimension_semantics = [#tpu.dimension_semantics<parallel>], iteration_bounds = array<i64: 2>, scalar_prefetch = 0 : i64, scratch_operands = 0 : i64, tpu.core_type = #tpu.core_type<tc>, window_params = [{transform_indices = @transform_0, window_bounds = array<i64: 1, 8, 1664>}, {transform_indices = @transform_1, window_bounds = array<i64: 1, 1664, 256>}, {transform_indices = @transform_2, window_bounds = array<i64: 1, 8, 256>}]} {
    %c0 = arith.constant 0 : index
    %c0_0 = arith.constant 0 : index
    %c0_1 = arith.constant 0 : index
    %0 = vector.load %arg1[%c0, %c0_0, %c0_1] : memref<1x8x1664xbf16, #tpu.memory_space<vmem>>, vector<1x8x1664xbf16>
    %1 = vector.shape_cast %0 : vector<1x8x1664xbf16> to vector<8x1664xbf16>
    %c0_2 = arith.constant 0 : index
    %c0_3 = arith.constant 0 : index
    %c0_4 = arith.constant 0 : index
    %2 = vector.load %arg2[%c0_2, %c0_3, %c0_4] : memref<1x1664x256xbf16, #tpu.memory_space<vmem>>, vector<1x1664x256xbf16>
    %3 = vector.shape_cast %2 : vector<1x1664x256xbf16> to vector<1664x256xbf16>
    %cst = arith.constant dense<0.000000e+00> : vector<8x256xf32>
    %4 = tpu.matmul %1, %3, %cst {dimension_numbers = #tpu.dot_dimension_numbers<[1], [0], [0], [1], [0, 0, 1, 1], [], []>} : vector<8x1664xbf16>, vector<1664x256xbf16>, vector<8x256xf32> -> vector<8x256xf32>
    %c0_5 = arith.constant 0 : index
    %c0_6 = arith.constant 0 : index
    %c0_7 = arith.constant 0 : index
    %5 = vector.load %arg3[%c0_5, %c0_6, %c0_7] : memref<1x8x256xf32, #tpu.memory_space<vmem>>, vector<1x8x256xf32>
    %6 = vector.shape_cast %5 : vector<1x8x256xf32> to vector<8x256xf32>
    %7 = vector.shape_cast %4 : vector<8x256xf32> to vector<1x8x256xf32>
    tpu.vector_store %arg3[%c0_5, %c0_6, %c0_7], %7 {strides = array<i32>} : memref<1x8x256xf32, #tpu.memory_space<vmem>>, vector<1x8x256xf32>,
    return
  }
  func.func @transform_0(%arg0: i32) -> (i32, i32, i32) {
    %c0_i32 = arith.constant 0 : i32
    %c0_i32_0 = arith.constant 0 : i32
    %c0_i32_1 = arith.constant 0 : i32
    return %arg0, %c0_i32, %c0_i32_0 : i32, i32, i32
  }
  func.func @transform_1(%arg0: i32) -> (i32, i32, i32) {
    %c0_i32 = arith.constant 0 : i32
    %c0_i32_0 = arith.constant 0 : i32
    %c0_i32_1 = arith.constant 0 : i32
    return %arg0, %c0_i32, %c0_i32_0 : i32, i32, i32
  }
  func.func @transform_2(%arg0: i32) -> (i32, i32, i32) {
    %c0_i32 = arith.constant 0 : i32
    %c0_i32_0 = arith.constant 0 : i32
    %c0_i32_1 = arith.constant 0 : i32
    return %arg0, %c0_i32, %c0_i32_0 : i32, i32, i32
  }
}

</mosaic_0001>

<bundles_post_ra>
// kernel: siamfc_head_rpn_apply.1
= control target key start
LH: loop header
LB: loop body
LE: loop exit
PB: predicated region body
PF: predicated region fallthrough
CT: control target
= control target key end

     0   :  { %s2957_s9 = smov 0   ;;  %s3479_s0 = inlined_call_operand.vmem [shape: bf16[2,8,1664], index: 0, kind: input, shape index: {}]   ;;  %s3480_s1 = inlined_call_operand.vmem [shape: bf16[2,1664,256], index: 1, kind: input, shape index: {}]   ;;  %s3481_s2 = inlined_call_operand.vmem [shape: f32[2,8,256], index: 2, kind: output, shape index: {}]  }
   0x1 LB: > { %s1872_s10 = sadd.s32 4294967295, %s2940_s9   ;;  %p1876_p0 = scmp.ge.s32.totalorder %s2940_s9, 1  ;;  %s2940_s9 = sphi %s2957_s9, %s12_s9  }
   0x2   : > { %p122_p1 = scmp.lt.s32.totalorder %s2940_s9, 3 }
   0x4   : > { %p123_p2 = pnand %p1876_p0, %p122_p1 }
   0x5   : > { %p149_p3 = scmp.lt.s32.totalorder (!%p123_p2), %s1872_s10, 1 }
   0x6   : > { %126 = sbr.rel (%p123_p2) target bundleno = 376 (0x178), region = 28 }
   0xb   : > { %s3483_s10 = smov (!%p149_p3, %s1872_s10), 1 }
   0xc   : > { %s2925_s11 = smul.u32 1664, %s3483_s10  ;;  %s2715_s19 = sshll.u32 %s3483_s10, 4 }
   0xd   : > { %s2924_s15 = smul.u32 52, %s3483_s10  ;;  %s3472_s22 = scalar_lea.vmem %s3481_s2, %s2715_s19 }
   0xe   : > { %s2971_s14 = scalar_lea.vmem %s3480_s1, %s2925_s11 }
   0xf   : > { %v1939_v0 = vld [vmem:[%s2971_s14 + $0x70] sm:$0xf]  ;;  %v2731_v1 = vld [vmem:[%s2971_s14 + $0x74] sm:$0xf0]  ;;  %v1931_v11 = vld [vmem:[%s2971_s14 + $0x60] sm:$0xf]  ;;  %s3057_s18 = scalar_lea.vmem %s3479_s0, %s2924_s15 }
  0x10   : > { %v2003_v2 = vld [vmem:[%s2971_s14 + $0xf0] sm:$0xf]  ;;  %v1940_v3 = vor.u32 %v2731_v1, %v1939_v0  ;;  %v2747_v4 = vld [vmem:[%s2971_s14 + $0xf4] sm:$0xf0]  ;;  %v2729_v13 = vld [vmem:[%s2971_s14 + $0x64] sm:$0xf0] }
  0x11   : > { %v2067_v5 = vld [vmem:[%s2971_s14 + $0x170] sm:$0xf]  ;;  %v2763_v6 = vld [vmem:[%s2971_s14 + $0x174] sm:$0xf0]  ;;  %v2004_v7 = vor.u32 %v2747_v4, %v2003_v2  ;;  %v1995_v14 = vld [vmem:[%s2971_s14 + $0xe0] sm:$0xf]  ;;  %v1932_v16 = vor.u32 %v2729_v13, %v1931_v11 }
  0x12   : > { %v2068_v8 = vor.u32 %v2763_v6, %v2067_v5  ;;  %v2131_v9 = vld [vmem:[%s2971_s14 + $0x1f0] sm:$0xf]  ;;  %v2779_v10 = vld [vmem:[%s2971_s14 + $0x1f4] sm:$0xf0]  ;;  %1465 = vmatpush.bf16.msra.mxu0 %v1940_v3  ;;  %v2745_v15 = vld [vmem:[%s2971_s14 + $0xe4] sm:$0xf0] }
  0x13   : > { %v2132_v12 = vor.u32 %v2779_v10, %v2131_v9  ;;  %1478 = vmatpush.bf16.msra.mxu1 %v2004_v7  ;;  %v1996_v17 = vor.u32 %v2745_v15, %v1995_v14  ;;  %v2059_v18 = vld [vmem:[%s2971_s14 + $0x160] sm:$0xf]  ;;  %v2761_v19 = vld [vmem:[%s2971_s14 + $0x164] sm:$0xf0]  ;;  %v1923_v23 = vld [vmem:[%s2971_s14 + $0x50] sm:$0xf] }
  0x14   : > { %1491 = vmatpush.bf16.msra.mxu2 %v2068_v8  ;;  %v2123_v20 = vld [vmem:[%s2971_s14 + $0x1e0] sm:$0xf]  ;;  %v2060_v21 = vor.u32 %v2761_v19, %v2059_v18  ;;  %v2777_v22 = vld [vmem:[%s2971_s14 + $0x1e4] sm:$0xf0]  ;;  %v2727_v24 = vld [vmem:[%s2971_s14 + $0x54] sm:$0xf0] }
  0x15   : > { %1504 = vmatpush.bf16.msra.mxu3 %v2132_v12  ;;  %v2124_v25 = vor.u32 %v2777_v22, %v2123_v20  ;;  %v1987_v26 = vld [vmem:[%s2971_s14 + $0xd0] sm:$0xf]  ;;  %v2743_v27 = vld [vmem:[%s2971_s14 + $0xd4] sm:$0xf0]  ;;  %v1924_v29 = vor.u32 %v2727_v24, %v1923_v23  ;;  %v1915_v35 = vld [vmem:[%s2971_s14 + $0x40] sm:$0xf] }
  0x16   : > { %v2051_v28 = vld [vmem:[%s2971_s14 + $0x150] sm:$0xf]  ;;  %1466 = vmatpush.bf16.msra.mxu0 %v1932_v16  ;;  %v2759_v30 = vld [vmem:[%s2971_s14 + $0x154] sm:$0xf0]  ;;  %v1988_v33 = vor.u32 %v2743_v27, %v1987_v26  ;;  %v2725_v36 = vld [vmem:[%s2971_s14 + $0x44] sm:$0xf0] }
  0x17   : > { %v2115_v31 = vld [vmem:[%s2971_s14 + $0x1d0] sm:$0xf]  ;;  %v2775_v32 = vld [vmem:[%s2971_s14 + $0x1d4] sm:$0xf0]  ;;  %1479 = vmatpush.bf16.msra.mxu1 %v1996_v17  ;;  %v2052_v34 = vor.u32 %v2759_v30, %v2051_v28  ;;  %v1979_v37 = vld [vmem:[%s2971_s14 + $0xc0] sm:$0xf]  ;;  %v1916_v44 = vor.u32 %v2725_v36, %v1915_v35 }
  0x18   : > { %1492 = vmatpush.bf16.msra.mxu2 %v2060_v21  ;;  %v2116_v38 = vor.u32 %v2775_v32, %v2115_v31  ;;  %v2741_v39 = vld [vmem:[%s2971_s14 + $0xc4] sm:$0xf0]  ;;  %v2043_v40 = vld [vmem:[%s2971_s14 + $0x140] sm:$0xf]  ;;  %v1907_v47 = vld [vmem:[%s2971_s14 + $0x30] sm:$0xf] }
  0x19   : > { %1505 = vmatpush.bf16.msra.mxu3 %v2124_v25  ;;  %v2757_v41 = vld [vmem:[%s2971_s14 + $0x144] sm:$0xf0]  ;;  %v2107_v42 = vld [vmem:[%s2971_s14 + $0x1c0] sm:$0xf]  ;;  %v1980_v45 = vor.u32 %v2741_v39, %v1979_v37  ;;  %v2723_v48 = vld [vmem:[%s2971_s14 + $0x34] sm:$0xf0] }
  0x1a   : > { %v2773_v43 = vld [vmem:[%s2971_s14 + $0x1c4] sm:$0xf0]  ;;  %1467 = vmatpush.bf16.msra.mxu0 %v1924_v29  ;;  %v2044_v46 = vor.u32 %v2757_v41, %v2043_v40  ;;  %v1971_v49 = vld [vmem:[%s2971_s14 + $0xb0] sm:$0xf]  ;;  %v2739_v51 = vld [vmem:[%s2971_s14 + $0xb4] sm:$0xf0]  ;;  %v1908_v56 = vor.u32 %v2723_v48, %v1907_v47 }
  0x1b   : > { %1480 = vmatpush.bf16.msra.mxu1 %v1988_v33  ;;  %v2108_v50 = vor.u32 %v2773_v43, %v2107_v42  ;;  %v2035_v52 = vld [vmem:[%s2971_s14 + $0x130] sm:$0xf]  ;;  %v2755_v53 = vld [vmem:[%s2971_s14 + $0x134] sm:$0xf0]  ;;  %v1972_v57 = vor.u32 %v2739_v51, %v1971_v49  ;;  %v1899_v59 = vld [vmem:[%s2971_s14 + $0x20] sm:$0xf] }
  0x1c   : > { %1493 = vmatpush.bf16.msra.mxu2 %v2052_v34  ;;  %v2099_v54 = vld [vmem:[%s2971_s14 + $0x1b0] sm:$0xf]  ;;  %v2771_v55 = vld [vmem:[%s2971_s14 + $0x1b4] sm:$0xf0]  ;;  %v2036_v58 = vor.u32 %v2755_v53, %v2035_v52  ;;  %v2721_v60 = vld [vmem:[%s2971_s14 + $0x24] sm:$0xf0] }
  0x1d   : > { %1506 = vmatpush.bf16.msra.mxu3 %v2116_v38  ;;  %v1963_v61 = vld [vmem:[%s2971_s14 + $0xa0] sm:$0xf]  ;;  %v2100_v62 = vor.u32 %v2771_v55, %v2099_v54  ;;  %v2737_v63 = vld [vmem:[%s2971_s14 + $0xa4] sm:$0xf0]  ;;  %v1900_v4 = vor.u32 %v2721_v60, %v1899_v59  ;;  %v1891_v7 = vld [vmem:[%s2971_s14 + $0x10] sm:$0xf] }
  0x1e   : > { %1468 = vmatpush.bf16.msra.mxu0 %v1916_v44  ;;  %v2027_v0 = vld [vmem:[%s2971_s14 + $0x120] sm:$0xf]  ;;  %v2753_v1 = vld [vmem:[%s2971_s14 + $0x124] sm:$0xf0]  ;;  %v1964_v5 = vor.u32 %v2737_v63, %v1963_v61  ;;  %v2719_v8 = vld [vmem:[%s2971_s14 + $0x14] sm:$0xf0] }
  0x1f   : > { %1481 = vmatpush.bf16.msra.mxu1 %v1980_v45  ;;  %v2091_v2 = vld [vmem:[%s2971_s14 + $0x1a0] sm:$0xf]  ;;  %v2769_v3 = vld [vmem:[%s2971_s14 + $0x1a4] sm:$0xf0]  ;;  %v2028_v6 = vor.u32 %v2753_v1, %v2027_v0  ;;  %v1955_v9 = vld [vmem:[%s2971_s14 + $0x90] sm:$0xf]  ;;  %v1892_v16 = vor.u32 %v2719_v8, %v1891_v7 }
  0x20   : > { %1494 = vmatpush.bf16.msra.mxu2 %v2044_v46  ;;  %v2092_v10 = vor.u32 %v2769_v3, %v2091_v2  ;;  %v2735_v11 = vld [vmem:[%s2971_s14 + $0x94] sm:$0xf0]  ;;  %v2019_v12 = vld [vmem:[%s2971_s14 + $0x110] sm:$0xf]  ;;  %v1883_v17 = vld [vmem:[%s2971_s14] sm:$0xf] }
  0x21   : > { %1507 = vmatpush.bf16.msra.mxu3 %v2108_v50  ;;  %v2751_v13 = vld [vmem:[%s2971_s14 + $0x114] sm:$0xf0]  ;;  %v2083_v14 = vld [vmem:[%s2971_s14 + $0x190] sm:$0xf]  ;;  %v2717_v18 = vld [vmem:[%s2971_s14 + $0x4] sm:$0xf0]  ;;  %v1956_v19 = vor.u32 %v2735_v11, %v1955_v9 }
  0x22   : > { %1469 = vmatpush.bf16.msra.mxu0 %v1908_v56  ;;  %v2767_v15 = vld [vmem:[%s2971_s14 + $0x194] sm:$0xf0]  ;;  %v2020_v20 = vor.u32 %v2751_v13, %v2019_v12  ;;  %v1947_v21 = vld [vmem:[%s2971_s14 + $0x80] sm:$0xf]  ;;  %v2733_v22 = vld [vmem:[%s2971_s14 + $0x84] sm:$0xf0]  ;;  %v1884_v31 = vor.u32 %v2717_v18, %v1883_v17 }
  0x23   : > { %1482 = vmatpush.bf16.msra.mxu1 %v1972_v57  ;;  %v2011_v23 = vld [vmem:[%s2971_s14 + $0x100] sm:$0xf]  ;;  %v2084_v24 = vor.u32 %v2767_v15, %v2083_v14  ;;  %v2749_v25 = vld [vmem:[%s2971_s14 + $0x104] sm:$0xf0]  ;;  %v2195_v26 = vld [vmem:[%s2971_s14 + $0x270] sm:$0xf]  ;;  %v1948_v35 = vor.u32 %v2733_v22, %v1947_v21 }
  0x24   : > { %1495 = vmatpush.bf16.msra.mxu2 %v2036_v58  ;;  %v2795_v27 = vld [vmem:[%s2971_s14 + $0x274] sm:$0xf0]  ;;  %v2259_v28 = vld [vmem:[%s2971_s14 + $0x2f0] sm:$0xf]  ;;  %v2075_v33 = vld [vmem:[%s2971_s14 + $0x180] sm:$0xf]  ;;  %v2012_v36 = vor.u32 %v2749_v25, %v2011_v23 }
  0x25   : > { %1508 = vmatpush.bf16.msra.mxu3 %v2100_v62  ;;  %v2811_v29 = vld [vmem:[%s2971_s14 + $0x2f4] sm:$0xf0]  ;;  %v2323_v30 = vld [vmem:[%s2971_s14 + $0x370] sm:$0xf]  ;;  %v2765_v34 = vld [vmem:[%s2971_s14 + $0x184] sm:$0xf0]  ;;  %v2196_v39 = vor.u32 %v2795_v27, %v2195_v26 }
  0x26   : > { %1470 = vmatpush.bf16.msra.mxu0 %v1900_v4  ;;  %v2827_v32 = vld [vmem:[%s2971_s14 + $0x374] sm:$0xf0]  ;;  %v2387_v37 = vld [vmem:[%s2971_s14 + $0x3f0] sm:$0xf]  ;;  %v2260_v40 = vor.u32 %v2811_v29, %v2259_v28  ;;  %v2187_v41 = vld [vmem:[%s2971_s14 + $0x260] sm:$0xf]  ;;  %v2076_v43 = vor.u32 %v2765_v34, %v2075_v33 }
  0x27   : > { %1483 = vmatpush.bf16.msra.mxu1 %v1964_v5  ;;  %v2843_v38 = vld [vmem:[%s2971_s14 + $0x3f4] sm:$0xf0]  ;;  %v2324_v42 = vor.u32 %v2827_v32, %v2323_v30  ;;  %v2793_v44 = vld [vmem:[%s2971_s14 + $0x264] sm:$0xf0]  ;;  %v2251_v45 = vld [vmem:[%s2971_s14 + $0x2e0] sm:$0xf] }
  0x28   : > { %1496 = vmatpush.bf16.msra.mxu2 %v2028_v6  ;;  %v2809_v46 = vld [vmem:[%s2971_s14 + $0x2e4] sm:$0xf0]  ;;  %v2388_v47 = vor.u32 %v2843_v38, %v2387_v37  ;;  %v2315_v48 = vld [vmem:[%s2971_s14 + $0x360] sm:$0xf]  ;;  %v2188_v52 = vor.u32 %v2793_v44, %v2187_v41  ;;  %v2179_v54 = vld [vmem:[%s2971_s14 + $0x250] sm:$0xf] }
  0x29   : > { %1509 = vmatpush.bf16.msra.mxu3 %v2092_v10  ;;  %v2825_v49 = vld [vmem:[%s2971_s14 + $0x364] sm:$0xf0]  ;;  %v2379_v50 = vld [vmem:[%s2971_s14 + $0x3e0] sm:$0xf]  ;;  %v2252_v53 = vor.u32 %v2809_v46, %v2251_v45  ;;  %v2791_v55 = vld [vmem:[%s2971_s14 + $0x254] sm:$0xf0] }
  0x2a   : > { %1471 = vmatpush.bf16.msra.mxu0 %v1892_v16  ;;  %v2841_v51 = vld [vmem:[%s2971_s14 + $0x3e4] sm:$0xf0]  ;;  %v2316_v56 = vor.u32 %v2825_v49, %v2315_v48  ;;  %v2243_v57 = vld [vmem:[%s2971_s14 + $0x2d0] sm:$0xf]  ;;  %v2807_v58 = vld [vmem:[%s2971_s14 + $0x2d4] sm:$0xf0]  ;;  %v2180_v2 = vor.u32 %v2791_v55, %v2179_v54 }
  0x2b   : > { %1484 = vmatpush.bf16.msra.mxu1 %v1956_v19  ;;  %v165_v59 = vld [vmem:[%s3057_s18 + $0x8] sm:$0xff]  ;;  %v2380_v60 = vor.u32 %v2841_v51, %v2379_v50  ;;  %v2307_v61 = vld [vmem:[%s2971_s14 + $0x350] sm:$0xf]  ;;  %v2823_v62 = vld [vmem:[%s2971_s14 + $0x354] sm:$0xf0]  ;;  %v2244_v7 = vor.u32 %v2807_v58, %v2243_v57 }
  0x2c   : > { %1497 = vmatpush.bf16.msra.mxu2 %v2020_v20  ;;  %v388_v63 = vunpack.c.l.b16 %v165_v59  ;;  %v164_v0 = vld [vmem:[%s3057_s18] sm:$0xff]  ;;  %v389_v1 = vunpack.c.h.b16 %v165_v59  ;;  %v2371_v3 = vld [vmem:[%s2971_s14 + $0x3d0] sm:$0xf]  ;;  %v2839_v4 = vld [vmem:[%s2971_s14 + $0x3d4] sm:$0xf0]  ;;  %v2308_v11 = vor.u32 %v2823_v62, %v2307_v61 }
  0x2d   : > { %1510 = vmatpush.bf16.msra.mxu3 %v2084_v24  ;;  %v386_v5 = vunpack.c.l.b16 %v164_v0  ;;  %v387_v6 = vunpack.c.h.b16 %v164_v0  ;;  %v2171_v8 = vld [vmem:[%s2971_s14 + $0x240] sm:$0xf]  ;;  %v2789_v12 = vld [vmem:[%s2971_s14 + $0x244] sm:$0xf0]  ;;  %v2372_v17 = vor.u32 %v2839_v4, %v2371_v3  ;;  %v2163_v24 = vld [vmem:[%s2971_s14 + $0x230] sm:$0xf] }
  0x2e   : > { %1472 = vmatpush.bf16.msra.mxu0 %v1884_v31  ;;  %v3072_v9 = vpack.c.b16 %v388_v63, %v388_v63  ;;  %v3074_v10 = vpack.c.b16 %v389_v1, %v389_v1  ;;  %v2235_v13 = vld [vmem:[%s2971_s14 + $0x2c0] sm:$0xf]  ;;  %v2805_v14 = vld [vmem:[%s2971_s14 + $0x2c4] sm:$0xf0]  ;;  %v2172_v22 = vor.u32 %v2789_v12, %v2171_v8  ;;  %v2787_v26 = vld [vmem:[%s2971_s14 + $0x234] sm:$0xf0] }
  0x2f   : > { %1485 = vmatpush.bf16.msra.mxu1 %v1948_v35  ;;  %v3079_v15 = vpack.c.b16 %v386_v5, %v386_v5  ;;  %v3081_v16 = vpack.c.b16 %v387_v6, %v387_v6  ;;  %v2299_v18 = vld [vmem:[%s2971_s14 + $0x340] sm:$0xf]  ;;  %v2821_v19 = vld [vmem:[%s2971_s14 + $0x344] sm:$0xf0]  ;;  %v2236_v23 = vor.u32 %v2805_v14, %v2235_v13  ;;  %v2227_v27 = vld [vmem:[%s2971_s14 + $0x2b0] sm:$0xf]  ;;  %v2164_v34 = vor.u32 %v2787_v26, %v2163_v24 }
  0x30   : > { %1498 = vmatpush.bf16.msra.mxu2 %v2012_v36  ;;  %v2363_v20 = vld [vmem:[%s2971_s14 + $0x3c0] sm:$0xf]  ;;  %v2837_v21 = vld [vmem:[%s2971_s14 + $0x3c4] sm:$0xf0]  ;;  %v2300_v25 = vor.u32 %v2821_v19, %v2299_v18  ;;  %v2803_v28 = vld [vmem:[%s2971_s14 + $0x2b4] sm:$0xf0] }
  0x31   : > { %1511 = vmatpush.bf16.msra.mxu3 %v2076_v43  ;;  %1473 = vmatmul.bf16.vlgmr.msra.gmra.mxu0 %v3079_v15  ;;  %v2364_v29 = vor.u32 %v2837_v21, %v2363_v20  ;;  %v2291_v30 = vld [vmem:[%s2971_s14 + $0x330] sm:$0xf]  ;;  %v2819_v31 = vld [vmem:[%s2971_s14 + $0x334] sm:$0xf0]  ;;  %v2228_v35 = vor.u32 %v2803_v28, %v2227_v27  ;;  %v2155_v36 = vld [vmem:[%s2971_s14 + $0x220] sm:$0xf] }
  0x32   : > { %1517 = vmatpush.bf16.msrb.mxu0 %v2196_v39  ;;  %1486 = vmatmul.bf16.vlgmr.msra.gmra.mxu1 %v3081_v16  ;;  %v2355_v32 = vld [vmem:[%s2971_s14 + $0x3b0] sm:$0xf]  ;;  %v2835_v33 = vld [vmem:[%s2971_s14 + $0x3b4] sm:$0xf0]  ;;  %v2292_v37 = vor.u32 %v2819_v31, %v2291_v30  ;;  %v2785_v38 = vld [vmem:[%s2971_s14 + $0x224] sm:$0xf0] }
  0x33   : > { %1530 = vmatpush.bf16.msrb.mxu1 %v2260_v40  ;;  %1499 = vmatmul.bf16.vlgmr.msra.gmra.mxu2 %v3072_v9  ;;  %v2219_v39 = vld [vmem:[%s2971_s14 + $0x2a0] sm:$0xf]  ;;  %v2801_v40 = vld [vmem:[%s2971_s14 + $0x2a4] sm:$0xf0]  ;;  %v2356_v41 = vor.u32 %v2835_v33, %v2355_v32  ;;  %v2156_v46 = vor.u32 %v2785_v38, %v2155_v36  ;;  %v2147_v48 = vld [vmem:[%s2971_s14 + $0x210] sm:$0xf] }
  0x34   : > { %1543 = vmatpush.bf16.msrb.mxu2 %v2324_v42  ;;  %1512 = vmatmul.bf16.vlgmr.msra.gmra.mxu3 %v3074_v10  ;;  %v2283_v42 = vld [vmem:[%s2971_s14 + $0x320] sm:$0xf]  ;;  %v2817_v43 = vld [vmem:[%s2971_s14 + $0x324] sm:$0xf0]  ;;  %v2783_v50 = vld [vmem:[%s2971_s14 + $0x214] sm:$0xf0] }
  0x35   : > { %1556 = vmatpush.bf16.msrb.mxu3 %v2388_v47  ;;  %v2347_v44 = vld [vmem:[%s2971_s14 + $0x3a0] sm:$0xf]  ;;  %v2833_v45 = vld [vmem:[%s2971_s14 + $0x3a4] sm:$0xf0]  ;;  %v2220_v47 = vor.u32 %v2801_v40, %v2219_v39  ;;  %v2284_v49 = vor.u32 %v2817_v43, %v2283_v42  ;;  %v2211_v51 = vld [vmem:[%s2971_s14 + $0x290] sm:$0xf] }
  0x36   : > { %1518 = vmatpush.bf16.msrb.mxu0 %v2188_v52  ;;  %v2799_v52 = vld [vmem:[%s2971_s14 + $0x294] sm:$0xf0]  ;;  %v2275_v54 = vld [vmem:[%s2971_s14 + $0x310] sm:$0xf]  ;;  %v2139_v58 = vld [vmem:[%s2971_s14 + $0x200] sm:$0xf] }
  0x37   : > { %1531 = vmatpush.bf16.msrb.mxu1 %v2252_v53  ;;  %v2348_v53 = vor.u32 %v2833_v45, %v2347_v44  ;;  %v2815_v55 = vld [vmem:[%s2971_s14 + $0x314] sm:$0xf0]  ;;  %v2781_v59 = vld [vmem:[%s2971_s14 + $0x204] sm:$0xf0]  ;;  %v2212_v61 = vor.u32 %v2799_v52, %v2211_v51  ;;  %v2203_v62 = vld [vmem:[%s2971_s14 + $0x280] sm:$0xf] }
  0x38   : > { %1544 = vmatpush.bf16.msrb.mxu2 %v2316_v56  ;;  %v2339_v56 = vld [vmem:[%s2971_s14 + $0x390] sm:$0xf]  ;;  %v2831_v57 = vld [vmem:[%s2971_s14 + $0x394] sm:$0xf0]  ;;  %v2797_v63 = vld [vmem:[%s2971_s14 + $0x284] sm:$0xf0]  ;;  %v2276_v1 = vor.u32 %v2815_v55, %v2275_v54 }
  0x39   : > { %1557 = vmatpush.bf16.msrb.mxu3 %v2380_v60  ;;  %v2148_v60 = vor.u32 %v2783_v50, %v2147_v48  ;;  %v166_v0 = vld [vmem:[%s3057_s18 + $0x10] sm:$0xff]  ;;  %v2813_v3 = vld [vmem:[%s2971_s14 + $0x304] sm:$0xf0]  ;;  %v167_v4 = vld [vmem:[%s3057_s18 + $0x18] sm:$0xff]  ;;  %v2340_v5 = vor.u32 %v2831_v57, %v2339_v56  ;;  %v2204_v18 = vor.u32 %v2797_v63, %v2203_v62 }
  0x3a   : > { %1519 = vmatpush.bf16.msrb.mxu0 %v2180_v2  ;;  %v2267_v2 = vld [vmem:[%s2971_s14 + $0x300] sm:$0xf]  ;;  %v2451_v6 = vld [vmem:[%s2971_s14 + $0x470] sm:$0xf]  ;;  %v2891_v13 = vld [vmem:[%s2971_s14 + $0x574] sm:$0xf0]  ;;  %v390_v14 = vunpack.c.l.b16 %v166_v0  ;;  %v392_v21 = vunpack.c.l.b16 %v167_v4  ;;  %v391_v26 = vunpack.c.h.b16 %v166_v0 }
  0x3b   : > { %1532 = vmatpush.bf16.msrb.mxu1 %v2244_v7  ;;  %v2859_v7 = vld [vmem:[%s2971_s14 + $0x474] sm:$0xf0]  ;;  %v2515_v8 = vld [vmem:[%s2971_s14 + $0x4f0] sm:$0xf]  ;;  %v2331_v19 = vld [vmem:[%s2971_s14 + $0x380] sm:$0xf] }
  0x3c   : > { %1545 = vmatpush.bf16.msrb.mxu2 %v2308_v11  ;;  %v2875_v11 = vld [vmem:[%s2971_s14 + $0x4f4] sm:$0xf0]  ;;  %v2579_v12 = vld [vmem:[%s2971_s14 + $0x570] sm:$0xf]  ;;  %v2829_v20 = vld [vmem:[%s2971_s14 + $0x384] sm:$0xf0]  ;;  %v3139_v36 = vpack.c.b16 %v390_v14, %v390_v14  ;;  %v3141_v39 = vpack.c.b16 %v392_v21, %v392_v21  ;;  %v3145_v43 = vpack.c.b16 %v391_v26, %v391_v26 }
  0x3d   : > { %1558 = vmatpush.bf16.msrb.mxu3 %v2372_v17  ;;  %v2140_v17 = vor.u32 %v2781_v59, %v2139_v58  ;;  %v2643_v24 = vld [vmem:[%s2971_s14 + $0x5f0] sm:$0xf]  ;;  %v2516_v27 = vor.u32 %v2875_v11, %v2515_v8  ;;  %v2580_v28 = vor.u32 %v2891_v13, %v2579_v12  ;;  %v2857_v30 = vld [vmem:[%s2971_s14 + $0x464] sm:$0xf0]  ;;  %v2507_v31 = vld [vmem:[%s2971_s14 + $0x4e0] sm:$0xf]  ;;  %v2332_v32 = vor.u32 %v2829_v20, %v2331_v19 }
  0x3e   : > { %1520 = vmatpush.bf16.msrb.mxu0 %v2172_v22  ;;  %v2268_v22 = vor.u32 %v2813_v3, %v2267_v2  ;;  %v2873_v33 = vld [vmem:[%s2971_s14 + $0x4e4] sm:$0xf0]  ;;  %v2499_v48 = vld [vmem:[%s2971_s14 + $0x4d0] sm:$0xf]  ;;  %v2871_v50 = vld [vmem:[%s2971_s14 + $0x4d4] sm:$0xf0] }
  0x3f   : > { %1533 = vmatpush.bf16.msrb.mxu1 %v2236_v23  ;;  %v2452_v23 = vor.u32 %v2859_v7, %v2451_v6  ;;  %v2905_v42 = vld [vmem:[%s2971_s14 + $0x5e4] sm:$0xf0]  ;;  %v2508_v44 = vor.u32 %v2873_v33, %v2507_v31  ;;  %v2563_v51 = vld [vmem:[%s2971_s14 + $0x550] sm:$0xf]  ;;  %v2887_v52 = vld [vmem:[%s2971_s14 + $0x554] sm:$0xf0]  ;;  %v2500_v57 = vor.u32 %v2871_v50, %v2499_v48 }
  0x40   : > { %1546 = vmatpush.bf16.msrb.mxu2 %v2300_v25  ;;  %v2907_v25 = vld [vmem:[%s2971_s14 + $0x5f4] sm:$0xf0]  ;;  %v2627_v55 = vld [vmem:[%s2971_s14 + $0x5d0] sm:$0xf]  ;;  %v2564_v58 = vor.u32 %v2887_v52, %v2563_v51  ;;  %v2427_v59 = vld [vmem:[%s2971_s14 + $0x440] sm:$0xf] }
  0x41   : > { %1559 = vmatpush.bf16.msrb.mxu3 %v2364_v29  ;;  %v2443_v29 = vld [vmem:[%s2971_s14 + $0x460] sm:$0xf]  ;;  %v2644_v38 = vor.u32 %v2907_v25, %v2643_v24  ;;  %v2903_v56 = vld [vmem:[%s2971_s14 + $0x5d4] sm:$0xf0]  ;;  %v2869_v62 = vld [vmem:[%s2971_s14 + $0x4c4] sm:$0xf0] }
  0x42   : > { %1521 = vmatpush.bf16.msrb.mxu0 %v2164_v34  ;;  %v2571_v34 = vld [vmem:[%s2971_s14 + $0x560] sm:$0xf]  ;;  %v2444_v40 = vor.u32 %v2857_v30, %v2443_v29  ;;  %v2885_v0 = vld [vmem:[%s2971_s14 + $0x544] sm:$0xf0]  ;;  %v2419_v7 = vld [vmem:[%s2971_s14 + $0x430] sm:$0xf] }
  0x43   : > { %1534 = vmatpush.bf16.msrb.mxu1 %v2228_v35  ;;  %v2889_v35 = vld [vmem:[%s2971_s14 + $0x564] sm:$0xf0]  ;;  %v2555_v63 = vld [vmem:[%s2971_s14 + $0x540] sm:$0xf]  ;;  %v2851_v8 = vld [vmem:[%s2971_s14 + $0x434] sm:$0xf0] }
  0x44   : > { %1547 = vmatpush.bf16.msrb.mxu2 %v2292_v37  ;;  %v393_v37 = vunpack.c.h.b16 %v167_v4  ;;  %v2572_v45 = vor.u32 %v2889_v35, %v2571_v34  ;;  %v2619_v3 = vld [vmem:[%s2971_s14 + $0x5c0] sm:$0xf]  ;;  %v2901_v4 = vld [vmem:[%s2971_s14 + $0x5c4] sm:$0xf0]  ;;  %v2556_v6 = vor.u32 %v2885_v0, %v2555_v63  ;;  %v2483_v11 = vld [vmem:[%s2971_s14 + $0x4b0] sm:$0xf] }
  0x45   : > { %1560 = vmatpush.bf16.msrb.mxu3 %v2356_v41  ;;  %v2635_v41 = vld [vmem:[%s2971_s14 + $0x5e0] sm:$0xf]  ;;  %v2867_v12 = vld [vmem:[%s2971_s14 + $0x4b4] sm:$0xf0]  ;;  %v2547_v13 = vld [vmem:[%s2971_s14 + $0x530] sm:$0xf] }
  0x46   : > { %1522 = vmatpush.bf16.msrb.mxu0 %v2156_v46  ;;  %v2435_v46 = vld [vmem:[%s2971_s14 + $0x450] sm:$0xf]  ;;  %v2883_v14 = vld [vmem:[%s2971_s14 + $0x534] sm:$0xf0]  ;;  %v2484_v21 = vor.u32 %v2867_v12, %v2483_v11  ;;  %v2849_v24 = vld [vmem:[%s2971_s14 + $0x424] sm:$0xf0] }
  0x47   : > { %1535 = vmatpush.bf16.msrb.mxu1 %v2220_v47  ;;  %v2855_v47 = vld [vmem:[%s2971_s14 + $0x454] sm:$0xf0]  ;;  %v2611_v19 = vld [vmem:[%s2971_s14 + $0x5b0] sm:$0xf]  ;;  %v2475_v25 = vld [vmem:[%s2971_s14 + $0x4a0] sm:$0xf] }
  0x48   : > { %1548 = vmatpush.bf16.msrb.mxu2 %v2284_v49  ;;  %v3151_v49 = vpack.c.b16 %v393_v37, %v393_v37  ;;  %v2436_v54 = vor.u32 %v2855_v47, %v2435_v46  ;;  %v2899_v20 = vld [vmem:[%s2971_s14 + $0x5b4] sm:$0xf0]  ;;  %v2865_v26 = vld [vmem:[%s2971_s14 + $0x4a4] sm:$0xf0]  ;;  %v2603_v31 = vld [vmem:[%s2971_s14 + $0x5a0] sm:$0xf] }
  0x49   : > { %1561 = vmatpush.bf16.msrb.mxu3 %v2348_v53  ;;  %v2636_v53 = vor.u32 %v2905_v42, %v2635_v41  ;;  %v2612_v29 = vor.u32 %v2899_v20, %v2611_v19  ;;  %v2476_v33 = vor.u32 %v2865_v26, %v2475_v25  ;;  %v2403_v35 = vld [vmem:[%s2971_s14 + $0x410] sm:$0xf]  ;;  %v2847_v37 = vld [vmem:[%s2971_s14 + $0x414] sm:$0xf0]  ;;  %v2395_v47 = vld [vmem:[%s2971_s14 + $0x400] sm:$0xf] }
  0x4a   : > { %1523 = vmatpush.bf16.msrb.mxu0 %v2148_v60  ;;  %v2853_v60 = vld [vmem:[%s2971_s14 + $0x444] sm:$0xf0]  ;;  %v2531_v41 = vld [vmem:[%s2971_s14 + $0x510] sm:$0xf]  ;;  %v2879_v42 = vld [vmem:[%s2971_s14 + $0x514] sm:$0xf0]  ;;  %v2404_v48 = vor.u32 %v2847_v37, %v2403_v35 }
  0x4b   : > { %1536 = vmatpush.bf16.msrb.mxu1 %v2212_v61  ;;  %v2491_v61 = vld [vmem:[%s2971_s14 + $0x4c0] sm:$0xf]  ;;  %v2428_v2 = vor.u32 %v2853_v60, %v2427_v59  ;;  %v2895_v46 = vld [vmem:[%s2971_s14 + $0x594] sm:$0xf0]  ;;  %v2845_v50 = vld [vmem:[%s2971_s14 + $0x404] sm:$0xf0] }
  0x4c   : > { %1549 = vmatpush.bf16.msrb.mxu2 %v2276_v1  ;;  %v2628_v1 = vor.u32 %v2903_v56, %v2627_v55  ;;  %v2459_v51 = vld [vmem:[%s2971_s14 + $0x480] sm:$0xf]  ;;  %v2861_v52 = vld [vmem:[%s2971_s14 + $0x484] sm:$0xf0]  ;;  %v2707_v59 = vld [vmem:[%s2971_s14 + $0x670] sm:$0xf] }
  0x4d   : > { %1562 = vmatpush.bf16.msrb.mxu3 %v2340_v5  ;;  %v2492_v5 = vor.u32 %v2869_v62, %v2491_v61  ;;  %v2523_v55 = vld [vmem:[%s2971_s14 + $0x500] sm:$0xf]  ;;  %v2923_v60 = vld [vmem:[%s2971_s14 + $0x674] sm:$0xf0]  ;;  %v2730_v62 = vld [vmem:[%s2971_s14 + $0x74] sm:$0xf] }
  0x4e   : > { %1524 = vmatpush.bf16.msrb.mxu0 %v2140_v17  ;;  %v2620_v17 = vor.u32 %v2901_v4, %v2619_v3  ;;  %v168_v56 = vld [vmem:[%s3057_s18 + $0x20] sm:$0xff]  ;;  %v1941_v63 = vld [vmem:[%s2971_s14 + $0x78] sm:$0xf0]  ;;  %v2746_v0 = vld [vmem:[%s2971_s14 + $0xf4] sm:$0xf]  ;;  %v2708_v12 = vor.u32 %v2923_v60, %v2707_v59 }
  0x4f   : > { %1537 = vmatpush.bf16.msrb.mxu1 %v2204_v18  ;;  %v2420_v18 = vor.u32 %v2851_v8, %v2419_v7  ;;  %v2587_v3 = vld [vmem:[%s2971_s14 + $0x580] sm:$0xf]  ;;  %v2893_v4 = vld [vmem:[%s2971_s14 + $0x584] sm:$0xf0]  ;;  %v2460_v7 = vor.u32 %v2861_v52, %v2459_v51  ;;  %v395_v11 = vunpack.c.h.b16 %v168_v56  ;;  %v1933_v26 = vld [vmem:[%s2971_s14 + $0x68] sm:$0xf0] }
  0x50   : > { %1550 = vmatpush.bf16.msrb.mxu2 %v2268_v22  ;;  %v2548_v22 = vor.u32 %v2883_v14, %v2547_v13  ;;  %v1944_v13 = vor.u32 %v2730_v62, %v1941_v63  ;;  %v2762_v14 = vld [vmem:[%s2971_s14 + $0x174] sm:$0xf]  ;;  %v2588_v20 = vor.u32 %v2893_v4, %v2587_v3  ;;  %v2045_v62 = vld [vmem:[%s2971_s14 + $0x148] sm:$0xf0]  ;;  %v1909_v4 = vld [vmem:[%s2971_s14 + $0x38] sm:$0xf0] }
  0x51   : > { %1563 = vmatpush.bf16.msrb.mxu3 %v2332_v32  ;;  %1525 = vmatmul.bf16.vlgmr.msrb.gmra.mxu0 %v3139_v36  ;;  %v2897_v32 = vld [vmem:[%s2971_s14 + $0x5a4] sm:$0xf0]  ;;  %v2722_v3 = vld [vmem:[%s2971_s14 + $0x34] sm:$0xf] }
  0x52   : > { %1569 = vmatpush.bf16.msra.mxu0 %v2452_v23  ;;  %1538 = vmatmul.bf16.vlgmr.msrb.gmra.mxu1 %v3145_v43  ;;  %v2411_v23 = vld [vmem:[%s2971_s14 + $0x420] sm:$0xf] }
  0x53   : > { %1582 = vmatpush.bf16.msra.mxu1 %v2516_v27  ;;  %1551 = vmatmul.bf16.vlgmr.msrb.gmra.mxu2 %v3141_v39  ;;  %v2539_v27 = vld [vmem:[%s2971_s14 + $0x520] sm:$0xf]  ;;  %v2412_v30 = vor.u32 %v2849_v24, %v2411_v23  ;;  %v2728_v23 = vld [vmem:[%s2971_s14 + $0x64] sm:$0xf] }
  0x54   : > { %1595 = vmatpush.bf16.msra.mxu2 %v2580_v28  ;;  %1564 = vmatmul.bf16.vlgmr.msrb.gmra.mxu3 %v3151_v49  ;;  %v2881_v28 = vld [vmem:[%s2971_s14 + $0x524] sm:$0xf0]  ;;  %v1936_v35 = vor.u32 %v2728_v23, %v1933_v26 }
  0x55   : > { %1608 = vmatpush.bf16.msra.mxu3 %v2644_v38  ;;  %v2540_v34 = vor.u32 %v2881_v28, %v2539_v27  ;;  %v2467_v38 = vld [vmem:[%s2971_s14 + $0x490] sm:$0xf]  ;;  %v2744_v27 = vld [vmem:[%s2971_s14 + $0xe4] sm:$0xf]  ;;  %v1997_v28 = vld [vmem:[%s2971_s14 + $0xe8] sm:$0xf0] }
  0x56   : > { %1570 = vmatpush.bf16.msra.mxu0 %v2444_v40  ;;  %v2863_v40 = vld [vmem:[%s2971_s14 + $0x494] sm:$0xf0]  ;;  %v2000_v37 = vor.u32 %v2744_v27, %v1997_v28  ;;  %v2752_v27 = vld [vmem:[%s2971_s14 + $0x124] sm:$0xf]  ;;  %v2029_v28 = vld [vmem:[%s2971_s14 + $0x128] sm:$0xf0] }
  0x57   : > { %1583 = vmatpush.bf16.msra.mxu1 %v2508_v44  ;;  %v2604_v44 = vor.u32 %v2897_v32, %v2603_v31 }
  0x58   : > { %1596 = vmatpush.bf16.msra.mxu2 %v2572_v45  ;;  %v2595_v45 = vld [vmem:[%s2971_s14 + $0x590] sm:$0xf] }
  0x59   : > { %1609 = vmatpush.bf16.msra.mxu3 %v2636_v53  ;;  %v2468_v53 = vor.u32 %v2863_v40, %v2467_v38  ;;  %v2596_v61 = vor.u32 %v2895_v46, %v2595_v45  ;;  %v2691_v38 = vld [vmem:[%s2971_s14 + $0x650] sm:$0xf]  ;;  %v2919_v40 = vld [vmem:[%s2971_s14 + $0x654] sm:$0xf0]  ;;  %v1989_v45 = vld [vmem:[%s2971_s14 + $0xd8] sm:$0xf0] }
  0x5a   : > { %1571 = vmatpush.bf16.msra.mxu0 %v2436_v54  ;;  %v2532_v54 = vor.u32 %v2879_v42, %v2531_v41  ;;  %v2726_v41 = vld [vmem:[%s2971_s14 + $0x54] sm:$0xf]  ;;  %v1925_v42 = vld [vmem:[%s2971_s14 + $0x58] sm:$0xf0] }
  0x5b   : > { %1584 = vmatpush.bf16.msra.mxu1 %v2500_v57  ;;  %v169_v57 = vld [vmem:[%s3057_s18 + $0x28] sm:$0xff]  ;;  %v1928_v51 = vor.u32 %v2726_v41, %v1925_v42  ;;  %v2032_v41 = vor.u32 %v2752_v27, %v2029_v28  ;;  %v2750_v42 = vld [vmem:[%s2971_s14 + $0x114] sm:$0xf] }
  0x5c   : > { %1597 = vmatpush.bf16.msra.mxu2 %v2564_v58  ;;  %v2877_v58 = vld [vmem:[%s2971_s14 + $0x504] sm:$0xf0] }
  0x5d   : > { %1610 = vmatpush.bf16.msra.mxu3 %v2628_v1  ;;  %v2396_v1 = vor.u32 %v2845_v50, %v2395_v47  ;;  %v2524_v8 = vor.u32 %v2877_v58, %v2523_v55  ;;  %v2692_v47 = vor.u32 %v2919_v40, %v2691_v38  ;;  %v2053_v50 = vld [vmem:[%s2971_s14 + $0x158] sm:$0xf0]  ;;  %v2724_v55 = vld [vmem:[%s2971_s14 + $0x44] sm:$0xf]  ;;  %v1981_v58 = vld [vmem:[%s2971_s14 + $0xc8] sm:$0xf0] }
  0x5e   : > { %1572 = vmatpush.bf16.msra.mxu0 %v2428_v2  ;;  %v2005_v2 = vld [vmem:[%s2971_s14 + $0xf8] sm:$0xf0]  ;;  %v2734_v38 = vld [vmem:[%s2971_s14 + $0x94] sm:$0xf] }
  0x5f   : > { %1585 = vmatpush.bf16.msra.mxu1 %v2492_v5  ;;  %v394_v5 = vunpack.c.l.b16 %v168_v56  ;;  %v2008_v19 = vor.u32 %v2746_v0, %v2005_v2  ;;  %v1917_v56 = vld [vmem:[%s2971_s14 + $0x48] sm:$0xf0]  ;;  %v2915_v2 = vld [vmem:[%s2971_s14 + $0x634] sm:$0xf0]  ;;  %v1957_v40 = vld [vmem:[%s2971_s14 + $0x98] sm:$0xf0] }
  0x60   : > { %1598 = vmatpush.bf16.msra.mxu2 %v2556_v6  ;;  %v396_v6 = vunpack.c.l.b16 %v169_v57  ;;  %v1920_v63 = vor.u32 %v2724_v55, %v1917_v56  ;;  %v1949_v55 = vld [vmem:[%s2971_s14 + $0x88] sm:$0xf0]  ;;  %v2778_v56 = vld [vmem:[%s2971_s14 + $0x1f4] sm:$0xf] }
  0x61   : > { %1611 = vmatpush.bf16.msra.mxu3 %v2620_v17  ;;  %v2069_v17 = vld [vmem:[%s2971_s14 + $0x178] sm:$0xf0]  ;;  %v3214_v24 = vpack.c.b16 %v394_v5, %v394_v5  ;;  %v2738_v5 = vld [vmem:[%s2971_s14 + $0xb4] sm:$0xf] }
  0x62   : > { %1573 = vmatpush.bf16.msra.mxu0 %v2420_v18  ;;  %v397_v18 = vunpack.c.h.b16 %v169_v57  ;;  %v3216_v25 = vpack.c.b16 %v396_v6, %v396_v6  ;;  %v2740_v57 = vld [vmem:[%s2971_s14 + $0xc4] sm:$0xf]  ;;  %v1973_v6 = vld [vmem:[%s2971_s14 + $0xb8] sm:$0xf0] }
  0x63   : > { %1586 = vmatpush.bf16.msra.mxu1 %v2484_v21  ;;  %v2699_v21 = vld [vmem:[%s2971_s14 + $0x660] sm:$0xf]  ;;  %v1984_v0 = vor.u32 %v2740_v57, %v1981_v58  ;;  %v2133_v57 = vld [vmem:[%s2971_s14 + $0x1f8] sm:$0xf0] }
  0x64   : > { %1599 = vmatpush.bf16.msra.mxu2 %v2548_v22  ;;  %v2921_v22 = vld [vmem:[%s2971_s14 + $0x664] sm:$0xf0]  ;;  %v3223_v31 = vpack.c.b16 %v397_v18, %v397_v18 }
  0x65   : > { %1612 = vmatpush.bf16.msra.mxu3 %v2612_v29  ;;  %v2072_v29 = vor.u32 %v2762_v14, %v2069_v17  ;;  %v2700_v32 = vor.u32 %v2921_v22, %v2699_v21  ;;  %v1976_v14 = vor.u32 %v2738_v5, %v1973_v6  ;;  %v2667_v17 = vld [vmem:[%s2971_s14 + $0x620] sm:$0xf]  ;;  %v2913_v18 = vld [vmem:[%s2971_s14 + $0x624] sm:$0xf0]  ;;  %v2736_v21 = vld [vmem:[%s2971_s14 + $0xa4] sm:$0xf] }
  0x66   : > { %1574 = vmatpush.bf16.msra.mxu0 %v2412_v30  ;;  %v3221_v30 = vpack.c.b16 %v395_v11, %v395_v11  ;;  %v2754_v11 = vld [vmem:[%s2971_s14 + $0x134] sm:$0xf]  ;;  %v1965_v22 = vld [vmem:[%s2971_s14 + $0xa8] sm:$0xf0]  ;;  %v2668_v26 = vor.u32 %v2913_v18, %v2667_v17  ;;  %v2325_v6 = vld [vmem:[%s2971_s14 + $0x378] sm:$0xf0] }
  0x67   : > { %1587 = vmatpush.bf16.msra.mxu1 %v2476_v33  ;;  %v2760_v33 = vld [vmem:[%s2971_s14 + $0x164] sm:$0xf]  ;;  %v2826_v5 = vld [vmem:[%s2971_s14 + $0x374] sm:$0xf]  ;;  %v2189_v18 = vld [vmem:[%s2971_s14 + $0x268] sm:$0xf0] }
  0x68   : > { %1600 = vmatpush.bf16.msra.mxu2 %v2540_v34  ;;  %v2061_v34 = vld [vmem:[%s2971_s14 + $0x168] sm:$0xf0]  ;;  %v2792_v17 = vld [vmem:[%s2971_s14 + $0x264] sm:$0xf] }
  0x69   : > { %1613 = vmatpush.bf16.msra.mxu3 %v2604_v44  ;;  %v2742_v44 = vld [vmem:[%s2971_s14 + $0xd4] sm:$0xf]  ;;  %v2064_v46 = vor.u32 %v2760_v33, %v2061_v34  ;;  %v2659_v33 = vld [vmem:[%s2971_s14 + $0x610] sm:$0xf]  ;;  %v2911_v34 = vld [vmem:[%s2971_s14 + $0x614] sm:$0xf0]  ;;  %v2192_v28 = vor.u32 %v2792_v17, %v2189_v18 }
  0x6a   : > { %1575 = vmatpush.bf16.msra.mxu0 %v2404_v48  ;;  %v2758_v48 = vld [vmem:[%s2971_s14 + $0x154] sm:$0xf]  ;;  %v1992_v52 = vor.u32 %v2742_v44, %v1989_v45  ;;  %v2021_v44 = vld [vmem:[%s2971_s14 + $0x118] sm:$0xf0]  ;;  %v2660_v45 = vor.u32 %v2911_v34, %v2659_v33  ;;  %v2285_v17 = vld [vmem:[%s2971_s14 + $0x328] sm:$0xf0] }
  0x6b   : > { %1588 = vmatpush.bf16.msra.mxu1 %v2468_v53  ;;  %v2683_v53 = vld [vmem:[%s2971_s14 + $0x640] sm:$0xf]  ;;  %v2056_v59 = vor.u32 %v2758_v48, %v2053_v50  ;;  %v2716_v48 = vld [vmem:[%s2971_s14 + $0x4] sm:$0xf]  ;;  %v2024_v58 = vor.u32 %v2750_v42, %v2021_v44  ;;  %v2117_v33 = vld [vmem:[%s2971_s14 + $0x1d8] sm:$0xf0] }
  0x6c   : > { %1601 = vmatpush.bf16.msra.mxu2 %v2532_v54  ;;  %v2917_v54 = vld [vmem:[%s2971_s14 + $0x644] sm:$0xf0]  ;;  %v2790_v34 = vld [vmem:[%s2971_s14 + $0x254] sm:$0xf]  ;;  %v2309_v42 = vld [vmem:[%s2971_s14 + $0x358] sm:$0xf0] }
  0x6d   : > { %1614 = vmatpush.bf16.msra.mxu3 %v2596_v61  ;;  %v2684_v60 = vor.u32 %v2917_v54, %v2683_v53  ;;  %v2756_v61 = vld [vmem:[%s2971_s14 + $0x144] sm:$0xf]  ;;  %v170_v54 = vld [vmem:[%s3057_s18 + $0x30] sm:$0xf] }
  0x6e   : > { %1576 = vmatpush.bf16.msra.mxu0 %v2396_v1  ;;  %v2675_v1 = vld [vmem:[%s2971_s14 + $0x630] sm:$0xf]  ;;  %v2732_v53 = vld [vmem:[%s2971_s14 + $0x84] sm:$0xf] }
  0x6f   : > { %1589 = vmatpush.bf16.msra.mxu1 %v2460_v7  ;;  %v2048_v7 = vor.u32 %v2756_v61, %v2045_v62  ;;  %v2810_v61 = vld [vmem:[%s2971_s14 + $0x2f4] sm:$0xf] }
  0x70   : > { %1602 = vmatpush.bf16.msra.mxu2 %v2524_v8  ;;  %v2676_v8 = vor.u32 %v2915_v2, %v2675_v1  ;;  %v2013_v1 = vld [vmem:[%s2971_s14 + $0x108] sm:$0xf0]  ;;  %v398_v2 = vunpack.c.l.b16 %v170_v54 }
  0x71   : > { %1615 = vmatpush.bf16.msra.mxu3 %v2588_v20  ;;  %1577 = vmatmul.bf16.vlgmr.msra.gmra.mxu0 %v3214_v24  ;;  %v1901_v20 = vld [vmem:[%s2971_s14 + $0x28] sm:$0xf0] }
  0x72   : > { %1621 = vmatpush.bf16.msrb.mxu0 %v2708_v12  ;;  %1590 = vmatmul.bf16.vlgmr.msra.gmra.mxu1 %v3221_v30  ;;  %v2037_v12 = vld [vmem:[%s2971_s14 + $0x138] sm:$0xf0]  ;;  %v2301_v54 = vld [vmem:[%s2971_s14 + $0x348] sm:$0xf0] }
  0x73   : > { %1634 = vmatpush.bf16.msrb.mxu1 %v1944_v13  ;;  %1603 = vmatmul.bf16.vlgmr.msra.gmra.mxu2 %v3216_v25  ;;  %v1912_v13 = vor.u32 %v2722_v3, %v1909_v4  ;;  %v2040_v23 = vor.u32 %v2754_v11, %v2037_v12  ;;  %v1952_v4 = vor.u32 %v2732_v53, %v1949_v55  ;;  %v2776_v11 = vld [vmem:[%s2971_s14 + $0x1e4] sm:$0xf] }
  0x74   : > { %1647 = vmatpush.bf16.msrb.mxu2 %v2008_v19  ;;  %1616 = vmatmul.bf16.vlgmr.msra.gmra.mxu3 %v3223_v31  ;;  %v2720_v19 = vld [vmem:[%s2971_s14 + $0x24] sm:$0xf] }
  0x75   : > { %1660 = vmatpush.bf16.msrb.mxu3 %v2072_v29  ;;  %v1904_v29 = vor.u32 %v2720_v19, %v1901_v20  ;;  %v3292_v19 = vpack.c.b16 %v398_v2, %v398_v2  ;;  %v2328_v20 = vor.u32 %v2826_v5, %v2325_v6  ;;  %v2820_v53 = vld [vmem:[%s2971_s14 + $0x344] sm:$0xf]  ;;  %v2093_v6 = vld [vmem:[%s2971_s14 + $0x1a8] sm:$0xf0] }
  0x76   : > { %1622 = vmatpush.bf16.msrb.mxu0 %v2700_v32  ;;  %v1968_v32 = vor.u32 %v2736_v21, %v1965_v22  ;;  %v2808_v21 = vld [vmem:[%s2971_s14 + $0x2e4] sm:$0xf]  ;;  %v2253_v22 = vld [vmem:[%s2971_s14 + $0x2e8] sm:$0xf0] }
  0x77   : > { %1635 = vmatpush.bf16.msrb.mxu1 %v1936_v35  ;;  %v2718_v35 = vld [vmem:[%s2971_s14 + $0x14] sm:$0xf] }
  0x78   : > { %1648 = vmatpush.bf16.msrb.mxu2 %v2000_v37  ;;  %v1893_v37 = vld [vmem:[%s2971_s14 + $0x18] sm:$0xf0] }
  0x79   : > { %1661 = vmatpush.bf16.msrb.mxu3 %v2064_v46  ;;  %v2651_v46 = vld [vmem:[%s2971_s14 + $0x600] sm:$0xf]  ;;  %v1896_v50 = vor.u32 %v2718_v35, %v1893_v37  ;;  %v2181_v35 = vld [vmem:[%s2971_s14 + $0x258] sm:$0xf0] }
  0x7a   : > { %1623 = vmatpush.bf16.msrb.mxu0 %v2692_v47  ;;  %v2909_v47 = vld [vmem:[%s2971_s14 + $0x604] sm:$0xf0] }
  0x7b   : > { %1636 = vmatpush.bf16.msrb.mxu1 %v1928_v51  ;;  %v1960_v51 = vor.u32 %v2734_v38, %v1957_v40  ;;  %v2652_v62 = vor.u32 %v2909_v47, %v2651_v46  ;;  %v2806_v38 = vld [vmem:[%s2971_s14 + $0x2d4] sm:$0xf]  ;;  %v2245_v40 = vld [vmem:[%s2971_s14 + $0x2d8] sm:$0xf0]  ;;  %v2772_v46 = vld [vmem:[%s2971_s14 + $0x1c4] sm:$0xf] }
  0x7c   : > { %1649 = vmatpush.bf16.msrb.mxu2 %v1992_v52  ;;  %v1885_v52 = vld [vmem:[%s2971_s14 + $0x8] sm:$0xf0]  ;;  %v2248_v47 = vor.u32 %v2806_v38, %v2245_v40  ;;  %v2764_v38 = vld [vmem:[%s2971_s14 + $0x184] sm:$0xf] }
  0x7d   : > { %1662 = vmatpush.bf16.msrb.mxu3 %v2056_v59  ;;  %v2794_v59 = vld [vmem:[%s2971_s14 + $0x274] sm:$0xf]  ;;  %v1888_v3 = vor.u32 %v2716_v48, %v1885_v52  ;;  %v2109_v48 = vld [vmem:[%s2971_s14 + $0x1c8] sm:$0xf0] }
  0x7e   : > { %1624 = vmatpush.bf16.msrb.mxu0 %v2684_v60  ;;  %v2197_v60 = vld [vmem:[%s2971_s14 + $0x278] sm:$0xf0]  ;;  %v2237_v52 = vld [vmem:[%s2971_s14 + $0x2c8] sm:$0xf0]  ;;  %v2112_v55 = vor.u32 %v2772_v46, %v2109_v48  ;;  %v2842_v48 = vld [vmem:[%s2971_s14 + $0x3f4] sm:$0xf] }
  0x7f   : > { %1637 = vmatpush.bf16.msrb.mxu1 %v1920_v63  ;;  %v2261_v63 = vld [vmem:[%s2971_s14 + $0x2f8] sm:$0xf0]  ;;  %v2077_v40 = vld [vmem:[%s2971_s14 + $0x188] sm:$0xf0] }
  0x80   : > { %1650 = vmatpush.bf16.msrb.mxu2 %v1984_v0  ;;  %v2748_v0 = vld [vmem:[%s2971_s14 + $0x104] sm:$0xf]  ;;  %v2264_v12 = vor.u32 %v2810_v61, %v2261_v63  ;;  %v2304_v61 = vor.u32 %v2820_v53, %v2301_v54  ;;  %v2229_v63 = vld [vmem:[%s2971_s14 + $0x2b8] sm:$0xf0]  ;;  %v2205_v46 = vld [vmem:[%s2971_s14 + $0x288] sm:$0xf0]  ;;  %v2080_v53 = vor.u32 %v2764_v38, %v2077_v40 }
  0x81   : > { %1663 = vmatpush.bf16.msrb.mxu3 %v2048_v7  ;;  %v2136_v7 = vor.u32 %v2778_v56, %v2133_v57  ;;  %v2770_v57 = vld [vmem:[%s2971_s14 + $0x1b4] sm:$0xf]  ;;  %v2557_v38 = vld [vmem:[%s2971_s14 + $0x548] sm:$0xf0] }
  0x82   : > { %1625 = vmatpush.bf16.msrb.mxu0 %v2676_v8  ;;  %v2200_v8 = vor.u32 %v2794_v59, %v2197_v60  ;;  %v2786_v59 = vld [vmem:[%s2971_s14 + $0x234] sm:$0xf]  ;;  %v2165_v60 = vld [vmem:[%s2971_s14 + $0x238] sm:$0xf0] }
  0x83   : > { %1638 = vmatpush.bf16.msrb.mxu1 %v1912_v13  ;;  %v2016_v13 = vor.u32 %v2748_v0, %v2013_v1  ;;  %v2818_v0 = vld [vmem:[%s2971_s14 + $0x334] sm:$0xf]  ;;  %v2293_v1 = vld [vmem:[%s2971_s14 + $0x338] sm:$0xf0] }
  0x84   : > { %1651 = vmatpush.bf16.msrb.mxu2 %v1976_v14  ;;  %v2125_v14 = vld [vmem:[%s2971_s14 + $0x1e8] sm:$0xf0] }
  0x85   : > { %1664 = vmatpush.bf16.msrb.mxu3 %v2040_v23  ;;  %v2824_v23 = vld [vmem:[%s2971_s14 + $0x364] sm:$0xf]  ;;  %v2128_v27 = vor.u32 %v2776_v11, %v2125_v14  ;;  %v2296_v11 = vor.u32 %v2818_v0, %v2293_v1 }
  0x86   : > { %1626 = vmatpush.bf16.msrb.mxu0 %v2668_v26  ;;  %v2317_v26 = vld [vmem:[%s2971_s14 + $0x368] sm:$0xf0]  ;;  %v2816_v14 = vld [vmem:[%s2971_s14 + $0x324] sm:$0xf] }
  0x87   : > { %1639 = vmatpush.bf16.msrb.mxu1 %v1904_v29  ;;  %v2774_v29 = vld [vmem:[%s2971_s14 + $0x1d4] sm:$0xf]  ;;  %v2320_v37 = vor.u32 %v2824_v23, %v2317_v26  ;;  %v2085_v23 = vld [vmem:[%s2971_s14 + $0x198] sm:$0xf0]  ;;  %v2856_v1 = vld [vmem:[%s2971_s14 + $0x464] sm:$0xf] }
  0x88   : > { %1652 = vmatpush.bf16.msrb.mxu2 %v1968_v32  ;;  %v2256_v32 = vor.u32 %v2808_v21, %v2253_v22  ;;  %v2120_v44 = vor.u32 %v2774_v29, %v2117_v33  ;;  %v2766_v21 = vld [vmem:[%s2971_s14 + $0x194] sm:$0xf] }
  0x89   : > { %1665 = vmatpush.bf16.msrb.mxu3 %v2032_v41  ;;  %v2822_v41 = vld [vmem:[%s2971_s14 + $0x354] sm:$0xf] }
  0x8a   : > { %1627 = vmatpush.bf16.msrb.mxu0 %v2660_v45  ;;  %v2184_v45 = vor.u32 %v2790_v34, %v2181_v35  ;;  %v2782_v26 = vld [vmem:[%s2971_s14 + $0x214] sm:$0xf]  ;;  %v2277_v34 = vld [vmem:[%s2971_s14 + $0x318] sm:$0xf0]  ;;  %v2088_v35 = vor.u32 %v2766_v21, %v2085_v23 }
  0x8b   : > { %1640 = vmatpush.bf16.msrb.mxu1 %v1896_v50  ;;  %v2788_v50 = vld [vmem:[%s2971_s14 + $0x244] sm:$0xf]  ;;  %v2798_v29 = vld [vmem:[%s2971_s14 + $0x294] sm:$0xf] }
  0x8c   : > { %1653 = vmatpush.bf16.msrb.mxu2 %v1960_v51  ;;  %v2173_v51 = vld [vmem:[%s2971_s14 + $0x248] sm:$0xf0]  ;;  %v2814_v33 = vld [vmem:[%s2971_s14 + $0x314] sm:$0xf] }
  0x8d   : > { %1666 = vmatpush.bf16.msrb.mxu3 %v2024_v58  ;;  %v2176_v56 = vor.u32 %v2788_v50, %v2173_v51  ;;  %v2389_v50 = vld [vmem:[%s2971_s14 + $0x3f8] sm:$0xf0]  ;;  %v2858_v51 = vld [vmem:[%s2971_s14 + $0x474] sm:$0xf] }
  0x8e   : > { %1628 = vmatpush.bf16.msrb.mxu0 %v2652_v62  ;;  %v2802_v62 = vld [vmem:[%s2971_s14 + $0x2b4] sm:$0xf] }
  0x8f   : > { %1641 = vmatpush.bf16.msrb.mxu1 %v1888_v3  ;;  %v2168_v3 = vor.u32 %v2786_v59, %v2165_v60  ;;  %v2232_v5 = vor.u32 %v2802_v62, %v2229_v63  ;;  %v2581_v59 = vld [vmem:[%s2971_s14 + $0x578] sm:$0xf0]  ;;  %v2840_v62 = vld [vmem:[%s2971_s14 + $0x3e4] sm:$0xf]  ;;  %v2381_v63 = vld [vmem:[%s2971_s14 + $0x3e8] sm:$0xf0] }
  0x90   : > { %1654 = vmatpush.bf16.msrb.mxu2 %v1952_v4  ;;  %v2768_v4 = vld [vmem:[%s2971_s14 + $0x1a4] sm:$0xf]  ;;  %v2870_v21 = vld [vmem:[%s2971_s14 + $0x4d4] sm:$0xf] }
  0x91   : > { %1667 = vmatpush.bf16.msrb.mxu3 %v2016_v13  ;;  %1629 = vmatmul.bf16.vlgmr.msrb.gmra.mxu0 %v3292_v19  ;;  %v2221_v13 = vld [vmem:[%s2971_s14 + $0x2a8] sm:$0xf0]  ;;  %v2096_v18 = vor.u32 %v2768_v4, %v2093_v6  ;;  %v2872_v4 = vld [vmem:[%s2971_s14 + $0x4e4] sm:$0xf]  ;;  %v2384_v6 = vor.u32 %v2840_v62, %v2381_v63 }
  0x92   : > { %1673 = vmatpush.bf16.msra.mxu0 %v2136_v7  ;;  %1642 = vmatmul.bf16.vlgmr.msrb.gmra.mxu1 %v3079_v15  ;;  %v2312_v15 = vor.u32 %v2822_v41, %v2309_v42  ;;  %v2784_v7 = vld [vmem:[%s2971_s14 + $0x224] sm:$0xf]  ;;  %v2541_v63 = vld [vmem:[%s2971_s14 + $0x528] sm:$0xf0] }
  0x93   : > { %1686 = vmatpush.bf16.msra.mxu1 %v2200_v8  ;;  %1655 = vmatmul.bf16.vlgmr.msrb.gmra.mxu2 %v3081_v16  ;;  %v2804_v16 = vld [vmem:[%s2971_s14 + $0x2c4] sm:$0xf]  ;;  %v2157_v8 = vld [vmem:[%s2971_s14 + $0x228] sm:$0xf0] }
  0x94   : > { %1699 = vmatpush.bf16.msra.mxu2 %v2264_v12  ;;  %1668 = vmatmul.bf16.vlgmr.msrb.gmra.mxu3 %v3072_v9  ;;  %v2240_v58 = vor.u32 %v2804_v16, %v2237_v52  ;;  %v2101_v9 = vld [vmem:[%s2971_s14 + $0x1b8] sm:$0xf0]  ;;  %v2800_v12 = vld [vmem:[%s2971_s14 + $0x2a4] sm:$0xf]  ;;  %v2874_v16 = vld [vmem:[%s2971_s14 + $0x4f4] sm:$0xf] }
  0x95   : > { %1712 = vmatpush.bf16.msra.mxu3 %v2328_v20  ;;  %v2104_v2 = vor.u32 %v2770_v57, %v2101_v9  ;;  %v2160_v20 = vor.u32 %v2784_v7, %v2157_v8  ;;  %v2224_v22 = vor.u32 %v2800_v12, %v2221_v13  ;;  %v2780_v41 = vld [vmem:[%s2971_s14 + $0x204] sm:$0xf]  ;;  %v2517_v52 = vld [vmem:[%s2971_s14 + $0x4f8] sm:$0xf0]  ;;  %v2890_v9 = vld [vmem:[%s2971_s14 + $0x574] sm:$0xf] }
  0x96   : > { %1674 = vmatpush.bf16.msra.mxu0 %v2128_v27  ;;  %v2149_v27 = vld [vmem:[%s2971_s14 + $0x218] sm:$0xf0]  ;;  %v2888_v7 = vld [vmem:[%s2971_s14 + $0x564] sm:$0xf]  ;;  %v2573_v8 = vld [vmem:[%s2971_s14 + $0x568] sm:$0xf0] }
  0x97   : > { %1687 = vmatpush.bf16.msra.mxu1 %v2192_v28  ;;  %v2288_v28 = vor.u32 %v2816_v14, %v2285_v17  ;;  %v2838_v12 = vld [vmem:[%s2971_s14 + $0x3d4] sm:$0xf]  ;;  %v2373_v13 = vld [vmem:[%s2971_s14 + $0x3d8] sm:$0xf0]  ;;  %v2880_v62 = vld [vmem:[%s2971_s14 + $0x524] sm:$0xf] }
  0x98   : > { %1700 = vmatpush.bf16.msra.mxu2 %v2256_v32  ;;  %v2213_v32 = vld [vmem:[%s2971_s14 + $0x298] sm:$0xf0]  ;;  %v2854_v17 = vld [vmem:[%s2971_s14 + $0x454] sm:$0xf]  ;;  %v2376_v23 = vor.u32 %v2838_v12, %v2373_v13 }
  0x99   : > { %1713 = vmatpush.bf16.msra.mxu3 %v2320_v37  ;;  %v2152_v37 = vor.u32 %v2782_v26, %v2149_v27  ;;  %v2216_v42 = vor.u32 %v2798_v29, %v2213_v32  ;;  %v2565_v26 = vld [vmem:[%s2971_s14 + $0x558] sm:$0xf0]  ;;  %v2836_v27 = vld [vmem:[%s2971_s14 + $0x3c4] sm:$0xf] }
  0x9a   : > { %1675 = vmatpush.bf16.msra.mxu0 %v2120_v44  ;;  %v2141_v44 = vld [vmem:[%s2971_s14 + $0x208] sm:$0xf0]  ;;  %v2852_v32 = vld [vmem:[%s2971_s14 + $0x444] sm:$0xf] }
  0x9b   : > { %1688 = vmatpush.bf16.msra.mxu1 %v2184_v45  ;;  %v2796_v45 = vld [vmem:[%s2971_s14 + $0x284] sm:$0xf]  ;;  %v2144_v54 = vor.u32 %v2780_v41, %v2141_v44  ;;  %v2834_v41 = vld [vmem:[%s2971_s14 + $0x3b4] sm:$0xf] }
  0x9c   : > { %1701 = vmatpush.bf16.msra.mxu2 %v2248_v47  ;;  %v2280_v47 = vor.u32 %v2814_v33, %v2277_v34  ;;  %v2208_v57 = vor.u32 %v2796_v45, %v2205_v46  ;;  %v2429_v33 = vld [vmem:[%s2971_s14 + $0x448] sm:$0xf0]  ;;  %v2868_v34 = vld [vmem:[%s2971_s14 + $0x4c4] sm:$0xf]  ;;  %v2850_v45 = vld [vmem:[%s2971_s14 + $0x434] sm:$0xf] }
  0x9d   : > { %1714 = vmatpush.bf16.msra.mxu3 %v2312_v15  ;;  %v2453_v15 = vld [vmem:[%s2971_s14 + $0x478] sm:$0xf0]  ;;  %v2432_v40 = vor.u32 %v2852_v32, %v2429_v33  ;;  %v2461_v33 = vld [vmem:[%s2971_s14 + $0x488] sm:$0xf0] }
  0x9e   : > { %1676 = vmatpush.bf16.msra.mxu0 %v2112_v55  ;;  %v2812_v55 = vld [vmem:[%s2971_s14 + $0x304] sm:$0xf]  ;;  %v2456_v60 = vor.u32 %v2858_v51, %v2453_v15  ;;  %v2421_v46 = vld [vmem:[%s2971_s14 + $0x438] sm:$0xf0]  ;;  %v2882_v15 = vld [vmem:[%s2971_s14 + $0x534] sm:$0xf] }
  0x9f   : > { %1689 = vmatpush.bf16.msra.mxu1 %v2176_v56  ;;  %v2269_v56 = vld [vmem:[%s2971_s14 + $0x308] sm:$0xf0] }
  0xa0   : > { %1702 = vmatpush.bf16.msra.mxu2 %v2240_v58  ;;  %v2392_v58 = vor.u32 %v2842_v48, %v2389_v50  ;;  %v2272_v0 = vor.u32 %v2812_v55, %v2269_v56  ;;  %v2866_v48 = vld [vmem:[%s2971_s14 + $0x4b4] sm:$0xf]  ;;  %v2485_v50 = vld [vmem:[%s2971_s14 + $0x4b8] sm:$0xf0]  ;;  %v2848_v56 = vld [vmem:[%s2971_s14 + $0x424] sm:$0xf] }
  0xa1   : > { %1715 = vmatpush.bf16.msra.mxu3 %v2304_v61  ;;  %v2520_v61 = vor.u32 %v2874_v16, %v2517_v52  ;;  %v2549_v16 = vld [vmem:[%s2971_s14 + $0x538] sm:$0xf0]  ;;  %v2424_v52 = vor.u32 %v2850_v45, %v2421_v46  ;;  %v2488_v55 = vor.u32 %v2866_v48, %v2485_v50  ;;  %v2904_v45 = vld [vmem:[%s2971_s14 + $0x5e4] sm:$0xf]  ;;  %v2637_v46 = vld [vmem:[%s2971_s14 + $0x5e8] sm:$0xf0] }
  0xa2   : > { %1677 = vmatpush.bf16.msra.mxu0 %v2104_v2  ;;  %v2445_v2 = vld [vmem:[%s2971_s14 + $0x468] sm:$0xf0]  ;;  %v2920_v48 = vld [vmem:[%s2971_s14 + $0x664] sm:$0xf] }
  0xa3   : > { %1690 = vmatpush.bf16.msra.mxu1 %v2168_v3  ;;  %v2584_v3 = vor.u32 %v2890_v9, %v2581_v59  ;;  %v2552_v9 = vor.u32 %v2882_v15, %v2549_v16  ;;  %v2864_v59 = vld [vmem:[%s2971_s14 + $0x4a4] sm:$0xf]  ;;  %v2701_v50 = vld [vmem:[%s2971_s14 + $0x668] sm:$0xf0]  ;;  %v2640_v16 = vor.u32 %v2904_v45, %v2637_v46 }
  0xa4   : > { %1703 = vmatpush.bf16.msra.mxu2 %v2232_v5  ;;  %v2509_v5 = vld [vmem:[%s2971_s14 + $0x4e8] sm:$0xf0] }
  0xa5   : > { %1716 = vmatpush.bf16.msra.mxu3 %v2296_v11  ;;  %v2448_v11 = vor.u32 %v2856_v1, %v2445_v2  ;;  %v2512_v14 = vor.u32 %v2872_v4, %v2509_v5  ;;  %v2830_v2 = vld [vmem:[%s2971_s14 + $0x394] sm:$0xf] }
  0xa6   : > { %1678 = vmatpush.bf16.msra.mxu0 %v2096_v18  ;;  %v2437_v18 = vld [vmem:[%s2971_s14 + $0x458] sm:$0xf0]  ;;  %v2846_v5 = vld [vmem:[%s2971_s14 + $0x414] sm:$0xf] }
  0xa7   : > { %1691 = vmatpush.bf16.msra.mxu1 %v2160_v20  ;;  %v2576_v20 = vor.u32 %v2888_v7, %v2573_v8  ;;  %v2544_v7 = vor.u32 %v2880_v62, %v2541_v63  ;;  %v2862_v8 = vld [vmem:[%s2971_s14 + $0x494] sm:$0xf] }
  0xa8   : > { %1704 = vmatpush.bf16.msra.mxu2 %v2224_v22  ;;  %v2501_v22 = vld [vmem:[%s2971_s14 + $0x4d8] sm:$0xf0]  ;;  %v2898_v63 = vld [vmem:[%s2971_s14 + $0x5b4] sm:$0xf] }
  0xa9   : > { %1717 = vmatpush.bf16.msra.mxu3 %v2288_v28  ;;  %v2365_v28 = vld [vmem:[%s2971_s14 + $0x3c8] sm:$0xf0]  ;;  %v2504_v29 = vor.u32 %v2870_v21, %v2501_v22 }
  0xaa   : > { %1679 = vmatpush.bf16.msra.mxu0 %v2088_v35  ;;  %v2493_v35 = vld [vmem:[%s2971_s14 + $0x4c8] sm:$0xf0] }
  0xab   : > { %1692 = vmatpush.bf16.msra.mxu1 %v2152_v37  ;;  %v2884_v37 = vld [vmem:[%s2971_s14 + $0x544] sm:$0xf]  ;;  %v2496_v44 = vor.u32 %v2868_v34, %v2493_v35  ;;  %v2333_v22 = vld [vmem:[%s2971_s14 + $0x388] sm:$0xf0]  ;;  %v2709_v34 = vld [vmem:[%s2971_s14 + $0x678] sm:$0xf0] }
  0xac   : > { %1705 = vmatpush.bf16.msra.mxu2 %v2216_v42  ;;  %v2357_v42 = vld [vmem:[%s2971_s14 + $0x3b8] sm:$0xf0] }
  0xad   : > { %1718 = vmatpush.bf16.msra.mxu3 %v2280_v47  ;;  %v2560_v47 = vor.u32 %v2884_v37, %v2557_v38  ;;  %v2360_v51 = vor.u32 %v2834_v41, %v2357_v42  ;;  %v2525_v37 = vld [vmem:[%s2971_s14 + $0x508] sm:$0xf0] }
  0xae   : > { %1680 = vmatpush.bf16.msra.mxu0 %v2080_v53  ;;  %v2832_v53 = vld [vmem:[%s2971_s14 + $0x3a4] sm:$0xf] }
  0xaf   : > { %1693 = vmatpush.bf16.msra.mxu1 %v2144_v54  ;;  %v2349_v54 = vld [vmem:[%s2971_s14 + $0x3a8] sm:$0xf0] }
  0xb0   : > { %1706 = vmatpush.bf16.msra.mxu2 %v2208_v57  ;;  %v2413_v57 = vld [vmem:[%s2971_s14 + $0x428] sm:$0xf0] }
  0xb1   : > { %1719 = vmatpush.bf16.msra.mxu3 %v2272_v0  ;;  %1681 = vmatmul.bf16.vlgmr.msra.gmra.mxu0 %v3074_v10  ;;  %v2886_v10 = vld [vmem:[%s2971_s14 + $0x554] sm:$0xf]  ;;  %v3404_v0 = vpop.f32.mrf.mxu1  ;;  %v2416_v1 = vor.u32 %v2848_v56, %v2413_v57  ;;  %v2693_v56 = vld [vmem:[%s2971_s14 + $0x658] sm:$0xf0] }
  0xb2   : > { %1725 = vmatpush.bf16.msrb.mxu0 %v2392_v58  ;;  %1694 = vmatmul.bf16.vlgmr.msra.gmra.mxu1 %v3139_v36  ;;  %v2568_v36 = vor.u32 %v2886_v10, %v2565_v26  ;;  %v3398_v58 = vpop.f32.mrf.mxu0  ;;  %v2397_v10 = vld [vmem:[%s2971_s14 + $0x408] sm:$0xf0] }
  0xb3   : > { %1738 = vmatpush.bf16.msrb.mxu1 %v2456_v60  ;;  %1707 = vmatmul.bf16.vlgmr.msra.gmra.mxu2 %v3145_v43  ;;  %v2440_v43 = vor.u32 %v2854_v17, %v2437_v18  ;;  %v2477_v60 = vld [vmem:[%s2971_s14 + $0x4a8] sm:$0xf0]  ;;  %v2533_v17 = vld [vmem:[%s2971_s14 + $0x518] sm:$0xf0]  ;;  %v2828_v18 = vld [vmem:[%s2971_s14 + $0x384] sm:$0xf] }
  0xb4   : > { %1751 = vmatpush.bf16.msrb.mxu2 %v2520_v61  ;;  %1720 = vmatmul.bf16.vlgmr.msra.gmra.mxu3 %v3141_v39  ;;  %v2368_v39 = vor.u32 %v2836_v27, %v2365_v28  ;;  %v2352_v61 = vor.u32 %v2832_v53, %v2349_v54  ;;  %v2480_v4 = vor.u32 %v2864_v59, %v2477_v60  ;;  %v2906_v27 = vld [vmem:[%s2971_s14 + $0x5f4] sm:$0xf]  ;;  %v2645_v28 = vld [vmem:[%s2971_s14 + $0x5f8] sm:$0xf0]  ;;  %v2900_v59 = vld [vmem:[%s2971_s14 + $0x5c4] sm:$0xf] }
  0xb5   : > { %1764 = vmatpush.bf16.msrb.mxu3 %v2584_v3  ;;  %v2341_v3 = vld [vmem:[%s2971_s14 + $0x398] sm:$0xf0]  ;;  %v2336_v35 = vor.u32 %v2828_v18, %v2333_v22  ;;  %v2648_v41 = vor.u32 %v2906_v27, %v2645_v28  ;;  %v2902_v53 = vld [vmem:[%s2971_s14 + $0x5d4] sm:$0xf]  ;;  %v2621_v60 = vld [vmem:[%s2971_s14 + $0x5c8] sm:$0xf0] }
  0xb6   : > { %1726 = vmatpush.bf16.msrb.mxu0 %v2384_v6  ;;  %v2405_v6 = vld [vmem:[%s2971_s14 + $0x418] sm:$0xf0]  ;;  %v3412_v12 = vpop.f32.mrf.mxu2  ;;  %v2344_v13 = vor.u32 %v2830_v2, %v2341_v3  ;;  %v2914_v2 = vld [vmem:[%s2971_s14 + $0x634] sm:$0xf] }
  0xb7   : > { %1739 = vmatpush.bf16.msrb.mxu1 %v2448_v11  ;;  %v2469_v11 = vld [vmem:[%s2971_s14 + $0x498] sm:$0xf0]  ;;  %v2408_v21 = vor.u32 %v2846_v5, %v2405_v6  ;;  %v2896_v6 = vld [vmem:[%s2971_s14 + $0x5a4] sm:$0xf]  ;;  %v2894_v18 = vld [vmem:[%s2971_s14 + $0x594] sm:$0xf] }
  0xb8   : > { %1752 = vmatpush.bf16.msrb.mxu2 %v2512_v14  ;;  %v2878_v14 = vld [vmem:[%s2971_s14 + $0x514] sm:$0xf]  ;;  %v2472_v26 = vor.u32 %v2862_v8, %v2469_v11  ;;  %v2629_v54 = vld [vmem:[%s2971_s14 + $0x5d8] sm:$0xf0]  ;;  %v2912_v8 = vld [vmem:[%s2971_s14 + $0x624] sm:$0xf] }
  0xb9   : > { %1765 = vmatpush.bf16.msrb.mxu3 %v2576_v20  ;;  %v3417_v20 = vpop.f32.mrf.mxu3  ;;  %v2536_v32 = vor.u32 %v2878_v14, %v2533_v17  ;;  %v1489_v38 = vpop.f32.mrf.mxu1  ;;  %v2632_v57 = vor.u32 %v2902_v53, %v2629_v54  ;;  %v2669_v11 = vld [vmem:[%s2971_s14 + $0x628] sm:$0xf0] }
  0xba   : > { %1727 = vmatpush.bf16.msrb.mxu0 %v2376_v23  ;;  %v2844_v23 = vld [vmem:[%s2971_s14 + $0x404] sm:$0xf]  ;;  %v2672_v17 = vor.u32 %v2912_v8, %v2669_v11  ;;  %v1488_v38 = vadd.f32 %v3404_v0, %v3398_v58 }
  0xbb   : > { %1740 = vmatpush.bf16.msrb.mxu1 %v2440_v43  ;;  %v2860_v43 = vld [vmem:[%s2971_s14 + $0x484] sm:$0xf] }
  0xbc   : > { %1753 = vmatpush.bf16.msrb.mxu2 %v2504_v29  ;;  %v1476_v29 = vpop.f32.mrf.mxu0  ;;  %v2464_v42 = vor.u32 %v2860_v43, %v2461_v33  ;;  %v2908_v33 = vld [vmem:[%s2971_s14 + $0x604] sm:$0xf] }
  0xbd   : > { %1766 = vmatpush.bf16.msrb.mxu3 %v2568_v36  ;;  %v2922_v36 = vld [vmem:[%s2971_s14 + $0x674] sm:$0xf]  ;;  %v2892_v29 = vld [vmem:[%s2971_s14 + $0x584] sm:$0xf] }
  0xbe   : > { %1728 = vmatpush.bf16.msrb.mxu0 %v2368_v39  ;;  %v2876_v39 = vld [vmem:[%s2971_s14 + $0x504] sm:$0xf] }
  0xbf   : > { %1741 = vmatpush.bf16.msrb.mxu1 %v2432_v40  ;;  %v2400_v40 = vor.u32 %v2844_v23, %v2397_v10  ;;  %v2910_v23 = vld [vmem:[%s2971_s14 + $0x614] sm:$0xf]  ;;  %v2661_v10 = vld [vmem:[%s2971_s14 + $0x618] sm:$0xf0] }
  0xc0   : > { %1754 = vmatpush.bf16.msrb.mxu2 %v2496_v44  ;;  %v2712_v44 = vor.u32 %v2922_v36, %v2709_v34  ;;  %v2664_v28 = vor.u32 %v2910_v23, %v2661_v10  ;;  %v2653_v36 = vld [vmem:[%s2971_s14 + $0x608] sm:$0xf0] }
  0xc1   : > { %1767 = vmatpush.bf16.msrb.mxu3 %v2560_v47  ;;  %v2528_v47 = vor.u32 %v2876_v39, %v2525_v37  ;;  %v1515_v15 = vpop.f32.mrf.mxu3  ;;  %v2656_v39 = vor.u32 %v2908_v33, %v2653_v36 }
  0xc2   : > { %1729 = vmatpush.bf16.msrb.mxu0 %v2360_v51  ;;  %v1502_v51 = vpop.f32.mrf.mxu2 }
  0xc3   : > { %1742 = vmatpush.bf16.msrb.mxu1 %v2424_v52  ;;  %v2704_v52 = vor.u32 %v2920_v48, %v2701_v50 }
  0xc4   : > { %1755 = vmatpush.bf16.msrb.mxu2 %v2488_v55  ;;  %v2918_v55 = vld [vmem:[%s2971_s14 + $0x654] sm:$0xf] }
  0xc5   : > { %1768 = vmatpush.bf16.msrb.mxu3 %v2552_v9  ;;  %v2696_v9 = vor.u32 %v2918_v55, %v2693_v56 }
  0xc6   : > { %1730 = vmatpush.bf16.msrb.mxu0 %v2352_v61  ;;  %v2916_v61 = vld [vmem:[%s2971_s14 + $0x644] sm:$0xf] }
  0xc7   : > { %1743 = vmatpush.bf16.msrb.mxu1 %v2416_v1  ;;  %v2613_v1 = vld [vmem:[%s2971_s14 + $0x5b8] sm:$0xf0] }
  0xc8   : > { %1756 = vmatpush.bf16.msrb.mxu2 %v2480_v4  ;;  %v2616_v4 = vor.u32 %v2898_v63, %v2613_v1 }
  0xc9   : > { %1769 = vmatpush.bf16.msrb.mxu3 %v2544_v7  ;;  %v2605_v7 = vld [vmem:[%s2971_s14 + $0x5a8] sm:$0xf0] }
  0xca   : > { %1731 = vmatpush.bf16.msrb.mxu0 %v2344_v13  ;;  %v2608_v14 = vor.u32 %v2896_v6, %v2605_v7 }
  0xcb   : > { %1744 = vmatpush.bf16.msrb.mxu1 %v2408_v21  ;;  %v2597_v21 = vld [vmem:[%s2971_s14 + $0x598] sm:$0xf0] }
  0xcc   : > { %1757 = vmatpush.bf16.msrb.mxu2 %v2472_v26  ;;  %v2600_v27 = vor.u32 %v2894_v18, %v2597_v21 }
  0xcd   : > { %1770 = vmatpush.bf16.msrb.mxu3 %v2536_v32  ;;  %v2589_v32 = vld [vmem:[%s2971_s14 + $0x588] sm:$0xf0] }
  0xce   : > { %1732 = vmatpush.bf16.msrb.mxu0 %v2336_v35  ;;  %v1526_v62 = vpop.f32.mrf.mxu0  ;;  %v2592_v34 = vor.u32 %v2892_v29, %v2589_v32 }
  0xcf   : > { %1745 = vmatpush.bf16.msrb.mxu1 %v2400_v40  ;;  %v1539_v3 = vpop.f32.mrf.mxu1  ;;  %v1501_v40 = vadd.f32 %v3412_v12, %v1488_v38 }
  0xd0   : > { %1758 = vmatpush.bf16.msrb.mxu2 %v2464_v42 }
  0xd1   : > { %1771 = vmatpush.bf16.msrb.mxu3 %v2528_v47  ;;  %1733 = vmatmul.bf16.vlgmr.msrb.gmra.mxu0 %v3151_v49  ;;  %v2685_v49 = vld [vmem:[%s2971_s14 + $0x648] sm:$0xf0]  ;;  %v1514_v42 = vadd.f32 %v3417_v20, %v1501_v40 }
  0xd2   : > { %1777 = vmatpush.bf16.msra.mxu0 %v2648_v41  ;;  %1746 = vmatmul.bf16.vlgmr.msrb.gmra.mxu1 %v3214_v24  ;;  %v2624_v24 = vor.u32 %v2900_v59, %v2621_v60 }
  0xd3   : > { %1790 = vmatpush.bf16.msra.mxu1 %v2712_v44  ;;  %1759 = vmatmul.bf16.vlgmr.msrb.gmra.mxu2 %v3221_v30  ;;  %v2688_v30 = vor.u32 %v2916_v61, %v2685_v49  ;;  %v1527_v45 = vadd.f32 %v1526_v62, %v1514_v42 }
  0xd4   : > { %1772 = vmatmul.bf16.vlgmr.msrb.gmra.mxu3 %v3216_v25  ;;  %v2677_v25 = vld [vmem:[%s2971_s14 + $0x638] sm:$0xf0] }
  0xd5   : > { %v2680_v5 = vor.u32 %v2914_v2, %v2677_v25  ;;  %v1540_v50 = vadd.f32 %v1539_v3, %v1527_v45 }
  0xd6   : > { %1778 = vmatpush.bf16.msra.mxu0 %v2640_v16  ;;  %v1552_v13 = vpop.f32.mrf.mxu2  ;;  %v1528_v22 = vpop.f32.mrf.mxu0 }
  0xd7   : > { %1791 = vmatpush.bf16.msra.mxu1 %v2704_v52  ;;  %v1565_v26 = vpop.f32.mrf.mxu3  ;;  %v1541_v43 = vpop.f32.mrf.mxu1  ;;  %v1553_v15 = vadd.f32 %v1552_v13, %v1540_v50 }
  0xd9   : > { %v1566_v52 = vadd.f32 %v1565_v26, %v1553_v15 }
  0xda   : > { %1779 = vmatpush.bf16.msra.mxu0 %v2632_v57 }
  0xdb   : > { %1792 = vmatpush.bf16.msra.mxu1 %v2696_v9 }
  0xde   : > { %1780 = vmatpush.bf16.msra.mxu0 %v2624_v24  ;;  %v1554_v35 = vpop.f32.mrf.mxu2 }
  0xdf   : > { %1793 = vmatpush.bf16.msra.mxu1 %v2688_v30  ;;  %v1567_v37 = vpop.f32.mrf.mxu3 }
  0xe2   : > { %1781 = vmatpush.bf16.msra.mxu0 %v2616_v4 }
  0xe3   : > { %1794 = vmatpush.bf16.msra.mxu1 %v2680_v5 }
  0xe6   : > { %1782 = vmatpush.bf16.msra.mxu0 %v2608_v14 }
  0xe7   : > { %1795 = vmatpush.bf16.msra.mxu1 %v2672_v17 }
  0xea   : > { %1783 = vmatpush.bf16.msra.mxu0 %v2600_v27 }
  0xeb   : > { %1796 = vmatpush.bf16.msra.mxu1 %v2664_v28 }
  0xee   : > { %1784 = vmatpush.bf16.msra.mxu0 %v2592_v34  ;;  %v1578_v41 = vpop.f32.mrf.mxu0 }
  0xef   : > { %1797 = vmatpush.bf16.msra.mxu1 %v2656_v39  ;;  %v1591_v44 = vpop.f32.mrf.mxu1  ;;  %v1579_v58 = vadd.f32 %v1578_v41, %v1566_v52 }
  0xf1   : > { %1785 = vmatmul.bf16.vlgmr.msra.gmra.mxu0 %v3223_v31  ;;  %v1592_v0 = vadd.f32 %v1591_v44, %v1579_v58 }
  0xf2   : > { %1798 = vmatmul.bf16.vlgmr.msra.gmra.mxu1 %v3292_v19 }
  0xf6   : > { %v1604_v46 = vpop.f32.mrf.mxu2  ;;  %v1580_v48 = vpop.f32.mrf.mxu0 }
  0xf7   : > { %v1617_v47 = vpop.f32.mrf.mxu3  ;;  %v1593_v51 = vpop.f32.mrf.mxu1  ;;  %v1605_v19 = vadd.f32 %v1604_v46, %v1592_v0 }
  0xf9   : > { %v1618_v12 = vadd.f32 %v1617_v47, %v1605_v19 }
  0xfe   : > { %v1606_v31 = vpop.f32.mrf.mxu2 }
  0xff   : > { %v1619_v16 = vpop.f32.mrf.mxu3 }
 0x10e   : > { %v1630_v20 = vpop.f32.mrf.mxu0 }
 0x10f   : > { %v1631_v53 = vadd.f32 %v1630_v20, %v1618_v12  ;;  %v1643_v54 = vpop.f32.mrf.mxu1 }
 0x111   : > { %1803 = vst [vmem:[%s3472_s22] sm:$0xff] %v1631_v53 }
 0x116   : > { %v1656_v55 = vpop.f32.mrf.mxu2  ;;  %v1632_v56 = vpop.f32.mrf.mxu0 }
 0x117   : > { %v1669_v57 = vpop.f32.mrf.mxu3  ;;  %v1645_v9 = vpop.f32.mrf.mxu1  ;;  %v1657_v25 = vadd.f32 %v1656_v55, %v1643_v54 }
 0x119   : > { %v1670_v3 = vadd.f32 %v1669_v57, %v1657_v25 }
 0x11e   : > { %v1658_v59 = vpop.f32.mrf.mxu2 }
 0x11f   : > { %v1671_v60 = vpop.f32.mrf.mxu3 }
 0x12e   : > { %v1682_v61 = vpop.f32.mrf.mxu0 }
 0x12f   : > { %v1695_v49 = vpop.f32.mrf.mxu1  ;;  %v1683_v6 = vadd.f32 %v1682_v61, %v1670_v3 }
 0x131   : > { %v1696_v7 = vadd.f32 %v1695_v49, %v1683_v6 }
 0x136   : > { %v1708_v24 = vpop.f32.mrf.mxu2  ;;  %v1684_v30 = vpop.f32.mrf.mxu0 }
 0x137   : > { %v1721_v62 = vpop.f32.mrf.mxu3  ;;  %v1697_v63 = vpop.f32.mrf.mxu1  ;;  %v1709_v17 = vadd.f32 %v1708_v24, %v1696_v7 }
 0x139   : > { %v1722_v18 = vadd.f32 %v1721_v62, %v1709_v17 }
 0x13e   : > { %v1710_v1 = vpop.f32.mrf.mxu2 }
 0x13f   : > { %v1723_v2 = vpop.f32.mrf.mxu3 }
 0x14e   : > { %v1734_v4 = vpop.f32.mrf.mxu0 }
 0x14f   : > { %v1747_v5 = vpop.f32.mrf.mxu1  ;;  %v1735_v23 = vadd.f32 %v1734_v4, %v1722_v18 }
 0x151   : > { %v1748_v10 = vadd.f32 %v1747_v5, %v1735_v23 }
 0x156   : > { %v1760_v8 = vpop.f32.mrf.mxu2  ;;  %v1736_v11 = vpop.f32.mrf.mxu0 }
 0x157   : > { %v1773_v13 = vpop.f32.mrf.mxu3  ;;  %v1749_v14 = vpop.f32.mrf.mxu1  ;;  %v1761_v26 = vadd.f32 %v1760_v8, %v1748_v10 }
 0x159   : > { %v1774_v43 = vadd.f32 %v1773_v13, %v1761_v26 }
 0x15e   : > { %v1762_v21 = vpop.f32.mrf.mxu2 }
 0x15f   : > { %v1775_v22 = vpop.f32.mrf.mxu3 }
 0x16e   : > { %v1786_v27 = vpop.f32.mrf.mxu0 }
 0x16f   : > { %v1787_v28 = vadd.f32 %v1786_v27, %v1774_v43  ;;  %v1799_v29 = vpop.f32.mrf.mxu1 }
 0x171   : > { %v1800_v32 = vadd.f32 %v1799_v29, %v1787_v28 }
 0x173   : > { %1804 = vst [vmem:[%s3472_s22 + $0x8] sm:$0xff] %v1800_v32 }
 0x176   : > { %v1788_v33 = vpop.f32.mrf.mxu0 }
 0x177   : > { %v1801_v36 = vpop.f32.mrf.mxu1 }
 0x178 PF: > { %s12_s9 = sadd.s32 1, %s2940_s9  }
 0x179   : > { %p9_p4 = scmp.ge.s32.totalorder %s12_s9, 4  }
 0x17b   :  { %11 = sbr.rel (!%p9_p4) target bundleno = 1 (0x1), region = 61 }

</bundles_post_ra>
